<compile_context>
chip_gen: v6e
topology: v6e:2x2x1
jax: 0.10.0
libtpu: 0.0.40
codegen_flags: <defaults>
</compile_context>

<pallas_src>
import functools

import jax
import jax.numpy as jnp
from jax.experimental import pallas as pl
from jax.experimental.pallas import tpu as pltpu


def lstm_fc_kernel(x_ref, wih_ref, whh_ref, b_ref, wfc_ref, bfc_ref,
                   out_ref, xproj_ref, *, seq_len, batch, hidden):
    """Full LSTM recurrence over T steps + final Linear, single program.

    x_ref    : (T*B, E)   bf16 embedded inputs, time-major, flattened
    wih_ref  : (E, 4H)    bf16 input-to-hidden weights, gate cols [i,f,o,g]
    whh_ref  : (H, 4H)    bf16 hidden-to-hidden weights, gate cols [i,f,o,g]
    b_ref    : (1, 4H)    f32  b_ih + b_hh, gate cols [i,f,o,g]
    wfc_ref  : (H, Vp)    bf16 final linear weights (padded to lane width)
    bfc_ref  : (1, Vp)    f32  final linear bias (padded)
    out_ref  : (B, Vp)    f32  logits (padded)
    xproj_ref: (T*B, 4H)  f32  scratch: hoisted input projection
    """
    T, B, H = seq_len, batch, hidden

    # Hoisted input projection (one well-filled MXU matmul), bias folded in.
    xproj_ref[...] = (
        jnp.dot(x_ref[...], wih_ref[...], preferred_element_type=jnp.float32)
        + b_ref[...]
    )

    def step(t, carry):
        h, c = carry
        # Per-step critical path: a single (B,H)x(H,4H) matmul + gate math.
        gates = xproj_ref[pl.ds(t * B, B), :] + jnp.dot(
            h.astype(jnp.bfloat16), whh_ref[...],
            preferred_element_type=jnp.float32)
        # Gate columns are pre-permuted to [i, f, o, g]:
        # one contiguous sigmoid over 3H lanes, one tanh over H lanes.
        ifo = jax.nn.sigmoid(gates[:, :3 * H])
        g_g = jnp.tanh(gates[:, 3 * H:])
        i_g = ifo[:, 0 * H:1 * H]
        f_g = ifo[:, 1 * H:2 * H]
        o_g = ifo[:, 2 * H:3 * H]
        c_new = f_g * c + i_g * g_g
        h_new = o_g * jnp.tanh(c_new)
        return h_new, c_new

    h0 = jnp.zeros((B, H), jnp.float32)
    c0 = jnp.zeros((B, H), jnp.float32)
    # T is static & small -> fully unroll so the scheduler can interleave
    # MXU / EUP / VPU work across steps.
    h_final, _ = jax.lax.fori_loop(0, T, step, (h0, c0), unroll=True)

    out_ref[...] = (
        jnp.dot(h_final.astype(jnp.bfloat16), wfc_ref[...],
                preferred_element_type=jnp.float32)
        + bfc_ref[...]
    )


def init_params(key, vocab_size, embed_dim, hidden_dim):
    """Deterministic parameter init, shapes matching the PyTorch module."""
    ks = jax.random.split(key, 7)
    k = 1.0 / jnp.sqrt(jnp.float32(hidden_dim))
    u = lambda kk, shape, lim: jax.random.uniform(
        kk, shape, jnp.float32, minval=-lim, maxval=lim)
    return {
        "embedding": jax.random.normal(ks[0], (vocab_size, embed_dim), jnp.float32),
        "w_ih": u(ks[1], (4 * hidden_dim, embed_dim), k),   # like PyTorch weight_ih_l0
        "w_hh": u(ks[2], (4 * hidden_dim, hidden_dim), k),  # like PyTorch weight_hh_l0
        "b_ih": u(ks[3], (4 * hidden_dim,), k),
        "b_hh": u(ks[4], (4 * hidden_dim,), k),
        "w_fc": u(ks[5], (vocab_size, hidden_dim), k),      # like PyTorch fc.weight
        "b_fc": u(ks[6], (vocab_size,), k),
    }


def _reorder_gates(w4h, H):
    """Permute trailing 4H gate blocks from PyTorch [i,f,g,o] -> [i,f,o,g]."""
    return jnp.concatenate(
        [w4h[..., :2 * H], w4h[..., 3 * H:4 * H], w4h[..., 2 * H:3 * H]], axis=-1)


def chord_lstm_forward(tokens, params):
    """tokens: (B, T) int32 indices -> logits (B, vocab_size) float32."""
    emb = params["embedding"]                      # (V, E)
    vocab_size, embed_dim = emb.shape
    hidden_dim = params["w_hh"].shape[1]
    B, T = tokens.shape
    v_pad = ((vocab_size + 127) // 128) * 128      # lane-dense output width

    # Embedding gather, time-major directly: transpose the small int token
    # matrix instead of the (B,T,E) float activations.
    x_tbe = jnp.take(emb, tokens.T, axis=0)        # (T, B, E)
    x2d = x_tbe.reshape(T * B, embed_dim).astype(jnp.bfloat16)

    wih_t = _reorder_gates(params["w_ih"].T, hidden_dim).astype(jnp.bfloat16)  # (E, 4H)
    whh_t = _reorder_gates(params["w_hh"].T, hidden_dim).astype(jnp.bfloat16)  # (H, 4H)
    b = _reorder_gates(
        (params["b_ih"] + params["b_hh"]).reshape(1, 4 * hidden_dim), hidden_dim
    ).astype(jnp.float32)                                                      # (1, 4H)

    wfc_pad = jnp.zeros((hidden_dim, v_pad), jnp.bfloat16)
    wfc_pad = wfc_pad.at[:, :vocab_size].set(params["w_fc"].T.astype(jnp.bfloat16))
    bfc_pad = jnp.zeros((1, v_pad), jnp.float32)
    bfc_pad = bfc_pad.at[:, :vocab_size].set(params["b_fc"])

    kernel = functools.partial(
        lstm_fc_kernel, seq_len=T, batch=B, hidden=hidden_dim)

    out = pl.pallas_call(
        kernel,
        out_shape=jax.ShapeDtypeStruct((B, v_pad), jnp.float32),
        in_specs=[
            pl.BlockSpec(x2d.shape, lambda: (0, 0)),
            pl.BlockSpec(wih_t.shape, lambda: (0, 0)),
            pl.BlockSpec(whh_t.shape, lambda: (0, 0)),
            pl.BlockSpec(b.shape, lambda: (0, 0)),
            pl.BlockSpec(wfc_pad.shape, lambda: (0, 0)),
            pl.BlockSpec(bfc_pad.shape, lambda: (0, 0)),
        ],
        out_specs=pl.BlockSpec((B, v_pad), lambda: (0, 0)),
        scratch_shapes=[pltpu.VMEM((T * B, 4 * hidden_dim), jnp.float32)],
    )(x2d, wih_t, whh_t, b, wfc_pad, bfc_pad)
    return out[:, :vocab_size]


def chord_lstm_reference(tokens, params):
    """Pure-JAX f32 reference matching the PyTorch forward."""
    emb = params["embedding"]
    H = params["w_hh"].shape[1]
    B, T = tokens.shape
    x = jnp.take(emb, tokens, axis=0)              # (B, T, E)
    wih = params["w_ih"]                           # (4H, E), rows [i,f,g,o]
    whh = params["w_hh"]                           # (4H, H)
    b = params["b_ih"] + params["b_hh"]            # (4H,)

    def step(carry, x_t):
        h, c = carry
        gates = x_t @ wih.T + h @ whh.T + b        # (B, 4H)
        i_g = jax.nn.sigmoid(gates[:, 0 * H:1 * H])
        f_g = jax.nn.sigmoid(gates[:, 1 * H:2 * H])
        g_g = jnp.tanh(gates[:, 2 * H:3 * H])
        o_g = jax.nn.sigmoid(gates[:, 3 * H:4 * H])
        c_new = f_g * c + i_g * g_g
        h_new = o_g * jnp.tanh(c_new)
        return (h_new, c_new), None

    h0 = jnp.zeros((B, H), jnp.float32)
    c0 = jnp.zeros((B, H), jnp.float32)
    (h_final, _), _ = jax.lax.scan(step, (h0, c0), jnp.transpose(x, (1, 0, 2)))
    return h_final @ params["w_fc"].T + params["b_fc"]


if __name__ == "__main__":
    vocab_size = 64
    embed_dim = 64
    hidden_dim = 128
    batch = 8
    seq_len = 8

    key = jax.random.PRNGKey(0)
    k_tok, k_par = jax.random.split(key)

    tokens = jax.random.randint(k_tok, (batch, seq_len), 0, vocab_size, dtype=jnp.int32)
    params = init_params(k_par, vocab_size, embed_dim, hidden_dim)

    logits = chord_lstm_forward(tokens, params)
    jax.block_until_ready(logits)

    assert logits.shape == (batch, vocab_size)
    assert bool(jnp.all(jnp.isfinite(logits)))

    # Loose sanity check against the f32 reference (kernel matmuls run in bf16).
    ref = chord_lstm_reference(tokens, params)
    max_err = float(jnp.max(jnp.abs(logits - ref)))
    assert max_err < 0.25, f"kernel/reference mismatch: max abs err {max_err}"

    print("KERNEL_OK")
</pallas_src>

<mosaic_0001>
module attributes {stable_mosaic.version = 11 : i64} {
  func.func @lstm_fc_kernel(%arg0: memref<64x64xbf16, #tpu.memory_space<vmem>>, %arg1: memref<64x512xbf16, #tpu.memory_space<vmem>>, %arg2: memref<128x512xbf16, #tpu.memory_space<vmem>>, %arg3: memref<1x512xf32, #tpu.memory_space<vmem>>, %arg4: memref<128x128xbf16, #tpu.memory_space<vmem>>, %arg5: memref<1x128xf32, #tpu.memory_space<vmem>>, %arg6: memref<8x128xf32, #tpu.memory_space<vmem>>, %arg7: memref<64x512xf32, #tpu.memory_space<vmem>>) attributes {dimension_semantics = [], scalar_prefetch = 0 : i64, scratch_operands = 1 : i64, tpu.core_type = #tpu.core_type<tc>} {
    %c0 = arith.constant 0 : index
    %c0_0 = arith.constant 0 : index
    %0 = vector.load %arg0[%c0, %c0_0] : memref<64x64xbf16, #tpu.memory_space<vmem>>, vector<64x64xbf16>
    %c0_1 = arith.constant 0 : index
    %c0_2 = arith.constant 0 : index
    %1 = vector.load %arg1[%c0_1, %c0_2] : memref<64x512xbf16, #tpu.memory_space<vmem>>, vector<64x512xbf16>
    %cst = arith.constant dense<0.000000e+00> : vector<64x512xf32>
    %2 = tpu.matmul %0, %1, %cst {dimension_numbers = #tpu.dot_dimension_numbers<[1], [0], [0], [1], [0, 0, 1, 1], [], []>} : vector<64x64xbf16>, vector<64x512xbf16>, vector<64x512xf32> -> vector<64x512xf32>
    %c0_3 = arith.constant 0 : index
    %c0_4 = arith.constant 0 : index
    %3 = vector.load %arg3[%c0_3, %c0_4] : memref<1x512xf32, #tpu.memory_space<vmem>>, vector<1x512xf32>
    %4 = vector.broadcast %3 : vector<1x512xf32> to vector<64x512xf32>
    %5 = arith.addf %2, %4 : vector<64x512xf32>
    %c0_5 = arith.constant 0 : index
    %c0_6 = arith.constant 0 : index
    %6 = vector.load %arg7[%c0_5, %c0_6] : memref<64x512xf32, #tpu.memory_space<vmem>>, vector<64x512xf32>
    tpu.vector_store %arg7[%c0_5, %c0_6], %5 {strides = array<i32>} : memref<64x512xf32, #tpu.memory_space<vmem>>, vector<64x512xf32>,
    %cst_7 = arith.constant 0.000000e+00 : f32
    %7 = vector.broadcast %cst_7 : f32 to vector<8x128xf32>
    %cst_8 = arith.constant 0.000000e+00 : f32
    %8 = vector.broadcast %cst_8 : f32 to vector<8x128xf32>
    %c0_i32 = arith.constant 0 : i32
    %c8_i32 = arith.constant 8 : i32
    %9 = arith.muli %c0_i32, %c8_i32 : i32
    %10 = arith.index_cast %9 : i32 to index
    %c0_9 = arith.constant 0 : index
    %11 = vector.load %arg7[%10, %c0_9] : memref<64x512xf32, #tpu.memory_space<vmem>>, vector<8x512xf32>
    %12 = arith.truncf %7 : vector<8x128xf32> to vector<8x128xbf16>
    %c0_10 = arith.constant 0 : index
    %c0_11 = arith.constant 0 : index
    %13 = vector.load %arg2[%c0_10, %c0_11] : memref<128x512xbf16, #tpu.memory_space<vmem>>, vector<128x512xbf16>
    %cst_12 = arith.constant dense<0.000000e+00> : vector<8x512xf32>
    %14 = tpu.matmul %12, %13, %cst_12 {dimension_numbers = #tpu.dot_dimension_numbers<[1], [0], [0], [1], [0, 0, 1, 1], [], []>} : vector<8x128xbf16>, vector<128x512xbf16>, vector<8x512xf32> -> vector<8x512xf32>
    %15 = arith.addf %11, %14 : vector<8x512xf32>
    %16 = vector.extract_strided_slice %15 {offsets = [0, 0], sizes = [8, 384], strides = [1, 1]} : vector<8x512xf32> to vector<8x384xf32>
    %17 = arith.negf %16 : vector<8x384xf32>
    %18 = math.exp %17 : vector<8x384xf32>
    %cst_13 = arith.constant 1.000000e+00 : f32
    %19 = vector.broadcast %cst_13 : f32 to vector<8x384xf32>
    %20 = arith.addf %19, %18 : vector<8x384xf32>
    %21 = arith.divf %19, %20 : vector<8x384xf32>
    %22 = vector.extract_strided_slice %15 {offsets = [0, 384], sizes = [8, 128], strides = [1, 1]} : vector<8x512xf32> to vector<8x128xf32>
    %23 = math.tanh %22 : vector<8x128xf32>
    %24 = vector.extract_strided_slice %21 {offsets = [0, 0], sizes = [8, 128], strides = [1, 1]} : vector<8x384xf32> to vector<8x128xf32>
    %25 = vector.extract_strided_slice %21 {offsets = [0, 128], sizes = [8, 128], strides = [1, 1]} : vector<8x384xf32> to vector<8x128xf32>
    %26 = vector.extract_strided_slice %21 {offsets = [0, 256], sizes = [8, 128], strides = [1, 1]} : vector<8x384xf32> to vector<8x128xf32>
    %27 = arith.mulf %25, %8 : vector<8x128xf32>
    %28 = arith.mulf %24, %23 : vector<8x128xf32>
    %29 = arith.addf %27, %28 : vector<8x128xf32>
    %30 = math.tanh %29 : vector<8x128xf32>
    %31 = arith.mulf %26, %30 : vector<8x128xf32>
    %c1_i32 = arith.constant 1 : i32
    %c8_i32_14 = arith.constant 8 : i32
    %32 = arith.muli %c1_i32, %c8_i32_14 : i32
    %33 = arith.index_cast %32 : i32 to index
    %c0_15 = arith.constant 0 : index
    %34 = vector.load %arg7[%33, %c0_15] : memref<64x512xf32, #tpu.memory_space<vmem>>, vector<8x512xf32>
    %35 = arith.truncf %31 : vector<8x128xf32> to vector<8x128xbf16>
    %c0_16 = arith.constant 0 : index
    %c0_17 = arith.constant 0 : index
    %36 = vector.load %arg2[%c0_16, %c0_17] : memref<128x512xbf16, #tpu.memory_space<vmem>>, vector<128x512xbf16>
    %cst_18 = arith.constant dense<0.000000e+00> : vector<8x512xf32>
    %37 = tpu.matmul %35, %36, %cst_18 {dimension_numbers = #tpu.dot_dimension_numbers<[1], [0], [0], [1], [0, 0, 1, 1], [], []>} : vector<8x128xbf16>, vector<128x512xbf16>, vector<8x512xf32> -> vector<8x512xf32>
    %38 = arith.addf %34, %37 : vector<8x512xf32>
    %39 = vector.extract_strided_slice %38 {offsets = [0, 0], sizes = [8, 384], strides = [1, 1]} : vector<8x512xf32> to vector<8x384xf32>
    %40 = arith.negf %39 : vector<8x384xf32>
    %41 = math.exp %40 : vector<8x384xf32>
    %cst_19 = arith.constant 1.000000e+00 : f32
    %42 = vector.broadcast %cst_19 : f32 to vector<8x384xf32>
    %43 = arith.addf %42, %41 : vector<8x384xf32>
    %44 = arith.divf %42, %43 : vector<8x384xf32>
    %45 = vector.extract_strided_slice %38 {offsets = [0, 384], sizes = [8, 128], strides = [1, 1]} : vector<8x512xf32> to vector<8x128xf32>
    %46 = math.tanh %45 : vector<8x128xf32>
    %47 = vector.extract_strided_slice %44 {offsets = [0, 0], sizes = [8, 128], strides = [1, 1]} : vector<8x384xf32> to vector<8x128xf32>
    %48 = vector.extract_strided_slice %44 {offsets = [0, 128], sizes = [8, 128], strides = [1, 1]} : vector<8x384xf32> to vector<8x128xf32>
    %49 = vector.extract_strided_slice %44 {offsets = [0, 256], sizes = [8, 128], strides = [1, 1]} : vector<8x384xf32> to vector<8x128xf32>
    %50 = arith.mulf %48, %29 : vector<8x128xf32>
    %51 = arith.mulf %47, %46 : vector<8x128xf32>
    %52 = arith.addf %50, %51 : vector<8x128xf32>
    %53 = math.tanh %52 : vector<8x128xf32>
    %54 = arith.mulf %49, %53 : vector<8x128xf32>
    %c2_i32 = arith.constant 2 : i32
    %c8_i32_20 = arith.constant 8 : i32
    %55 = arith.muli %c2_i32, %c8_i32_20 : i32
    %56 = arith.index_cast %55 : i32 to index
    %c0_21 = arith.constant 0 : index
    %57 = vector.load %arg7[%56, %c0_21] : memref<64x512xf32, #tpu.memory_space<vmem>>, vector<8x512xf32>
    %58 = arith.truncf %54 : vector<8x128xf32> to vector<8x128xbf16>
    %c0_22 = arith.constant 0 : index
    %c0_23 = arith.constant 0 : index
    %59 = vector.load %arg2[%c0_22, %c0_23] : memref<128x512xbf16, #tpu.memory_space<vmem>>, vector<128x512xbf16>
    %cst_24 = arith.constant dense<0.000000e+00> : vector<8x512xf32>
    %60 = tpu.matmul %58, %59, %cst_24 {dimension_numbers = #tpu.dot_dimension_numbers<[1], [0], [0], [1], [0, 0, 1, 1], [], []>} : vector<8x128xbf16>, vector<128x512xbf16>, vector<8x512xf32> -> vector<8x512xf32>
    %61 = arith.addf %57, %60 : vector<8x512xf32>
    %62 = vector.extract_strided_slice %61 {offsets = [0, 0], sizes = [8, 384], strides = [1, 1]} : vector<8x512xf32> to vector<8x384xf32>
    %63 = arith.negf %62 : vector<8x384xf32>
    %64 = math.exp %63 : vector<8x384xf32>
    %cst_25 = arith.constant 1.000000e+00 : f32
    %65 = vector.broadcast %cst_25 : f32 to vector<8x384xf32>
    %66 = arith.addf %65, %64 : vector<8x384xf32>
    %67 = arith.divf %65, %66 : vector<8x384xf32>
    %68 = vector.extract_strided_slice %61 {offsets = [0, 384], sizes = [8, 128], strides = [1, 1]} : vector<8x512xf32> to vector<8x128xf32>
    %69 = math.tanh %68 : vector<8x128xf32>
    %70 = vector.extract_strided_slice %67 {offsets = [0, 0], sizes = [8, 128], strides = [1, 1]} : vector<8x384xf32> to vector<8x128xf32>
    %71 = vector.extract_strided_slice %67 {offsets = [0, 128], sizes = [8, 128], strides = [1, 1]} : vector<8x384xf32> to vector<8x128xf32>
    %72 = vector.extract_strided_slice %67 {offsets = [0, 256], sizes = [8, 128], strides = [1, 1]} : vector<8x384xf32> to vector<8x128xf32>
    %73 = arith.mulf %71, %52 : vector<8x128xf32>
    %74 = arith.mulf %70, %69 : vector<8x128xf32>
    %75 = arith.addf %73, %74 : vector<8x128xf32>
    %76 = math.tanh %75 : vector<8x128xf32>
    %77 = arith.mulf %72, %76 : vector<8x128xf32>
    %c3_i32 = arith.constant 3 : i32
    %c8_i32_26 = arith.constant 8 : i32
    %78 = arith.muli %c3_i32, %c8_i32_26 : i32
    %79 = arith.index_cast %78 : i32 to index
    %c0_27 = arith.constant 0 : index
    %80 = vector.load %arg7[%79, %c0_27] : memref<64x512xf32, #tpu.memory_space<vmem>>, vector<8x512xf32>
    %81 = arith.truncf %77 : vector<8x128xf32> to vector<8x128xbf16>
    %c0_28 = arith.constant 0 : index
    %c0_29 = arith.constant 0 : index
    %82 = vector.load %arg2[%c0_28, %c0_29] : memref<128x512xbf16, #tpu.memory_space<vmem>>, vector<128x512xbf16>
    %cst_30 = arith.constant dense<0.000000e+00> : vector<8x512xf32>
    %83 = tpu.matmul %81, %82, %cst_30 {dimension_numbers = #tpu.dot_dimension_numbers<[1], [0], [0], [1], [0, 0, 1, 1], [], []>} : vector<8x128xbf16>, vector<128x512xbf16>, vector<8x512xf32> -> vector<8x512xf32>
    %84 = arith.addf %80, %83 : vector<8x512xf32>
    %85 = vector.extract_strided_slice %84 {offsets = [0, 0], sizes = [8, 384], strides = [1, 1]} : vector<8x512xf32> to vector<8x384xf32>
    %86 = arith.negf %85 : vector<8x384xf32>
    %87 = math.exp %86 : vector<8x384xf32>
    %cst_31 = arith.constant 1.000000e+00 : f32
    %88 = vector.broadcast %cst_31 : f32 to vector<8x384xf32>
    %89 = arith.addf %88, %87 : vector<8x384xf32>
    %90 = arith.divf %88, %89 : vector<8x384xf32>
    %91 = vector.extract_strided_slice %84 {offsets = [0, 384], sizes = [8, 128], strides = [1, 1]} : vector<8x512xf32> to vector<8x128xf32>
    %92 = math.tanh %91 : vector<8x128xf32>
    %93 = vector.extract_strided_slice %90 {offsets = [0, 0], sizes = [8, 128], strides = [1, 1]} : vector<8x384xf32> to vector<8x128xf32>
    %94 = vector.extract_strided_slice %90 {offsets = [0, 128], sizes = [8, 128], strides = [1, 1]} : vector<8x384xf32> to vector<8x128xf32>
    %95 = vector.extract_strided_slice %90 {offsets = [0, 256], sizes = [8, 128], strides = [1, 1]} : vector<8x384xf32> to vector<8x128xf32>
    %96 = arith.mulf %94, %75 : vector<8x128xf32>
    %97 = arith.mulf %93, %92 : vector<8x128xf32>
    %98 = arith.addf %96, %97 : vector<8x128xf32>
    %99 = math.tanh %98 : vector<8x128xf32>
    %100 = arith.mulf %95, %99 : vector<8x128xf32>
    %c4_i32 = arith.constant 4 : i32
    %c8_i32_32 = arith.constant 8 : i32
    %101 = arith.muli %c4_i32, %c8_i32_32 : i32
    %102 = arith.index_cast %101 : i32 to index
    %c0_33 = arith.constant 0 : index
    %103 = vector.load %arg7[%102, %c0_33] : memref<64x512xf32, #tpu.memory_space<vmem>>, vector<8x512xf32>
    %104 = arith.truncf %100 : vector<8x128xf32> to vector<8x128xbf16>
    %c0_34 = arith.constant 0 : index
    %c0_35 = arith.constant 0 : index
    %105 = vector.load %arg2[%c0_34, %c0_35] : memref<128x512xbf16, #tpu.memory_space<vmem>>, vector<128x512xbf16>
    %cst_36 = arith.constant dense<0.000000e+00> : vector<8x512xf32>
    %106 = tpu.matmul %104, %105, %cst_36 {dimension_numbers = #tpu.dot_dimension_numbers<[1], [0], [0], [1], [0, 0, 1, 1], [], []>} : vector<8x128xbf16>, vector<128x512xbf16>, vector<8x512xf32> -> vector<8x512xf32>
    %107 = arith.addf %103, %106 : vector<8x512xf32>
    %108 = vector.extract_strided_slice %107 {offsets = [0, 0], sizes = [8, 384], strides = [1, 1]} : vector<8x512xf32> to vector<8x384xf32>
    %109 = arith.negf %108 : vector<8x384xf32>
    %110 = math.exp %109 : vector<8x384xf32>
    %cst_37 = arith.constant 1.000000e+00 : f32
    %111 = vector.broadcast %cst_37 : f32 to vector<8x384xf32>
    %112 = arith.addf %111, %110 : vector<8x384xf32>
    %113 = arith.divf %111, %112 : vector<8x384xf32>
    %114 = vector.extract_strided_slice %107 {offsets = [0, 384], sizes = [8, 128], strides = [1, 1]} : vector<8x512xf32> to vector<8x128xf32>
    %115 = math.tanh %114 : vector<8x128xf32>
    %116 = vector.extract_strided_slice %113 {offsets = [0, 0], sizes = [8, 128], strides = [1, 1]} : vector<8x384xf32> to vector<8x128xf32>
    %117 = vector.extract_strided_slice %113 {offsets = [0, 128], sizes = [8, 128], strides = [1, 1]} : vector<8x384xf32> to vector<8x128xf32>
    %118 = vector.extract_strided_slice %113 {offsets = [0, 256], sizes = [8, 128], strides = [1, 1]} : vector<8x384xf32> to vector<8x128xf32>
    %119 = arith.mulf %117, %98 : vector<8x128xf32>
    %120 = arith.mulf %116, %115 : vector<8x128xf32>
    %121 = arith.addf %119, %120 : vector<8x128xf32>
    %122 = math.tanh %121 : vector<8x128xf32>
    %123 = arith.mulf %118, %122 : vector<8x128xf32>
    %c5_i32 = arith.constant 5 : i32
    %c8_i32_38 = arith.constant 8 : i32
    %124 = arith.muli %c5_i32, %c8_i32_38 : i32
    %125 = arith.index_cast %124 : i32 to index
    %c0_39 = arith.constant 0 : index
    %126 = vector.load %arg7[%125, %c0_39] : memref<64x512xf32, #tpu.memory_space<vmem>>, vector<8x512xf32>
    %127 = arith.truncf %123 : vector<8x128xf32> to vector<8x128xbf16>
    %c0_40 = arith.constant 0 : index
    %c0_41 = arith.constant 0 : index
    %128 = vector.load %arg2[%c0_40, %c0_41] : memref<128x512xbf16, #tpu.memory_space<vmem>>, vector<128x512xbf16>
    %cst_42 = arith.constant dense<0.000000e+00> : vector<8x512xf32>
    %129 = tpu.matmul %127, %128, %cst_42 {dimension_numbers = #tpu.dot_dimension_numbers<[1], [0], [0], [1], [0, 0, 1, 1], [], []>} : vector<8x128xbf16>, vector<128x512xbf16>, vector<8x512xf32> -> vector<8x512xf32>
    %130 = arith.addf %126, %129 : vector<8x512xf32>
    %131 = vector.extract_strided_slice %130 {offsets = [0, 0], sizes = [8, 384], strides = [1, 1]} : vector<8x512xf32> to vector<8x384xf32>
    %132 = arith.negf %131 : vector<8x384xf32>
    %133 = math.exp %132 : vector<8x384xf32>
    %cst_43 = arith.constant 1.000000e+00 : f32
    %134 = vector.broadcast %cst_43 : f32 to vector<8x384xf32>
    %135 = arith.addf %134, %133 : vector<8x384xf32>
    %136 = arith.divf %134, %135 : vector<8x384xf32>
    %137 = vector.extract_strided_slice %130 {offsets = [0, 384], sizes = [8, 128], strides = [1, 1]} : vector<8x512xf32> to vector<8x128xf32>
    %138 = math.tanh %137 : vector<8x128xf32>
    %139 = vector.extract_strided_slice %136 {offsets = [0, 0], sizes = [8, 128], strides = [1, 1]} : vector<8x384xf32> to vector<8x128xf32>
    %140 = vector.extract_strided_slice %136 {offsets = [0, 128], sizes = [8, 128], strides = [1, 1]} : vector<8x384xf32> to vector<8x128xf32>
    %141 = vector.extract_strided_slice %136 {offsets = [0, 256], sizes = [8, 128], strides = [1, 1]} : vector<8x384xf32> to vector<8x128xf32>
    %142 = arith.mulf %140, %121 : vector<8x128xf32>
    %143 = arith.mulf %139, %138 : vector<8x128xf32>
    %144 = arith.addf %142, %143 : vector<8x128xf32>
    %145 = math.tanh %144 : vector<8x128xf32>
    %146 = arith.mulf %141, %145 : vector<8x128xf32>
    %c6_i32 = arith.constant 6 : i32
    %c8_i32_44 = arith.constant 8 : i32
    %147 = arith.muli %c6_i32, %c8_i32_44 : i32
    %148 = arith.index_cast %147 : i32 to index
    %c0_45 = arith.constant 0 : index
    %149 = vector.load %arg7[%148, %c0_45] : memref<64x512xf32, #tpu.memory_space<vmem>>, vector<8x512xf32>
    %150 = arith.truncf %146 : vector<8x128xf32> to vector<8x128xbf16>
    %c0_46 = arith.constant 0 : index
    %c0_47 = arith.constant 0 : index
    %151 = vector.load %arg2[%c0_46, %c0_47] : memref<128x512xbf16, #tpu.memory_space<vmem>>, vector<128x512xbf16>
    %cst_48 = arith.constant dense<0.000000e+00> : vector<8x512xf32>
    %152 = tpu.matmul %150, %151, %cst_48 {dimension_numbers = #tpu.dot_dimension_numbers<[1], [0], [0], [1], [0, 0, 1, 1], [], []>} : vector<8x128xbf16>, vector<128x512xbf16>, vector<8x512xf32> -> vector<8x512xf32>
    %153 = arith.addf %149, %152 : vector<8x512xf32>
    %154 = vector.extract_strided_slice %153 {offsets = [0, 0], sizes = [8, 384], strides = [1, 1]} : vector<8x512xf32> to vector<8x384xf32>
    %155 = arith.negf %154 : vector<8x384xf32>
    %156 = math.exp %155 : vector<8x384xf32>
    %cst_49 = arith.constant 1.000000e+00 : f32
    %157 = vector.broadcast %cst_49 : f32 to vector<8x384xf32>
    %158 = arith.addf %157, %156 : vector<8x384xf32>
    %159 = arith.divf %157, %158 : vector<8x384xf32>
    %160 = vector.extract_strided_slice %153 {offsets = [0, 384], sizes = [8, 128], strides = [1, 1]} : vector<8x512xf32> to vector<8x128xf32>
    %161 = math.tanh %160 : vector<8x128xf32>
    %162 = vector.extract_strided_slice %159 {offsets = [0, 0], sizes = [8, 128], strides = [1, 1]} : vector<8x384xf32> to vector<8x128xf32>
    %163 = vector.extract_strided_slice %159 {offsets = [0, 128], sizes = [8, 128], strides = [1, 1]} : vector<8x384xf32> to vector<8x128xf32>
    %164 = vector.extract_strided_slice %159 {offsets = [0, 256], sizes = [8, 128], strides = [1, 1]} : vector<8x384xf32> to vector<8x128xf32>
    %165 = arith.mulf %163, %144 : vector<8x128xf32>
    %166 = arith.mulf %162, %161 : vector<8x128xf32>
    %167 = arith.addf %165, %166 : vector<8x128xf32>
    %168 = math.tanh %167 : vector<8x128xf32>
    %169 = arith.mulf %164, %168 : vector<8x128xf32>
    %c7_i32 = arith.constant 7 : i32
    %c8_i32_50 = arith.constant 8 : i32
    %170 = arith.muli %c7_i32, %c8_i32_50 : i32
    %171 = arith.index_cast %170 : i32 to index
    %c0_51 = arith.constant 0 : index
    %172 = vector.load %arg7[%171, %c0_51] : memref<64x512xf32, #tpu.memory_space<vmem>>, vector<8x512xf32>
    %173 = arith.truncf %169 : vector<8x128xf32> to vector<8x128xbf16>
    %c0_52 = arith.constant 0 : index
    %c0_53 = arith.constant 0 : index
    %174 = vector.load %arg2[%c0_52, %c0_53] : memref<128x512xbf16, #tpu.memory_space<vmem>>, vector<128x512xbf16>
    %cst_54 = arith.constant dense<0.000000e+00> : vector<8x512xf32>
    %175 = tpu.matmul %173, %174, %cst_54 {dimension_numbers = #tpu.dot_dimension_numbers<[1], [0], [0], [1], [0, 0, 1, 1], [], []>} : vector<8x128xbf16>, vector<128x512xbf16>, vector<8x512xf32> -> vector<8x512xf32>
    %176 = arith.addf %172, %175 : vector<8x512xf32>
    %177 = vector.extract_strided_slice %176 {offsets = [0, 0], sizes = [8, 384], strides = [1, 1]} : vector<8x512xf32> to vector<8x384xf32>
    %178 = arith.negf %177 : vector<8x384xf32>
    %179 = math.exp %178 : vector<8x384xf32>
    %cst_55 = arith.constant 1.000000e+00 : f32
    %180 = vector.broadcast %cst_55 : f32 to vector<8x384xf32>
    %181 = arith.addf %180, %179 : vector<8x384xf32>
    %182 = arith.divf %180, %181 : vector<8x384xf32>
    %183 = vector.extract_strided_slice %176 {offsets = [0, 384], sizes = [8, 128], strides = [1, 1]} : vector<8x512xf32> to vector<8x128xf32>
    %184 = math.tanh %183 : vector<8x128xf32>
    %185 = vector.extract_strided_slice %182 {offsets = [0, 0], sizes = [8, 128], strides = [1, 1]} : vector<8x384xf32> to vector<8x128xf32>
    %186 = vector.extract_strided_slice %182 {offsets = [0, 128], sizes = [8, 128], strides = [1, 1]} : vector<8x384xf32> to vector<8x128xf32>
    %187 = vector.extract_strided_slice %182 {offsets = [0, 256], sizes = [8, 128], strides = [1, 1]} : vector<8x384xf32> to vector<8x128xf32>
    %188 = arith.mulf %186, %167 : vector<8x128xf32>
    %189 = arith.mulf %185, %184 : vector<8x128xf32>
    %190 = arith.addf %188, %189 : vector<8x128xf32>
    %191 = math.tanh %190 : vector<8x128xf32>
    %192 = arith.mulf %187, %191 : vector<8x128xf32>
    %c8_i32_56 = arith.constant 8 : i32
    %193 = arith.truncf %192 : vector<8x128xf32> to vector<8x128xbf16>
    %c0_57 = arith.constant 0 : index
    %c0_58 = arith.constant 0 : index
    %194 = vector.load %arg4[%c0_57, %c0_58] : memref<128x128xbf16, #tpu.memory_space<vmem>>, vector<128x128xbf16>
    %cst_59 = arith.constant dense<0.000000e+00> : vector<8x128xf32>
    %195 = tpu.matmul %193, %194, %cst_59 {dimension_numbers = #tpu.dot_dimension_numbers<[1], [0], [0], [1], [0, 0, 1, 1], [], []>} : vector<8x128xbf16>, vector<128x128xbf16>, vector<8x128xf32> -> vector<8x128xf32>
    %c0_60 = arith.constant 0 : index
    %c0_61 = arith.constant 0 : index
    %196 = vector.load %arg5[%c0_60, %c0_61] : memref<1x128xf32, #tpu.memory_space<vmem>>, vector<1x128xf32>
    %197 = vector.broadcast %196 : vector<1x128xf32> to vector<8x128xf32>
    %198 = arith.addf %195, %197 : vector<8x128xf32>
    %c0_62 = arith.constant 0 : index
    %c0_63 = arith.constant 0 : index
    %199 = vector.load %arg6[%c0_62, %c0_63] : memref<8x128xf32, #tpu.memory_space<vmem>>, vector<8x128xf32>
    tpu.vector_store %arg6[%c0_62, %c0_63], %198 {strides = array<i32>} : memref<8x128xf32, #tpu.memory_space<vmem>>, vector<8x128xf32>,
    return
  }
}

</mosaic_0001>

<bundles_post_ra>
// kernel: tpu_custom_call.1
= control target key start
LH: loop header
LB: loop body
LE: loop exit
PB: predicated region body
PF: predicated region fallthrough
CT: control target
= control target key end

     0   :  { %11 = vsyncpa [#allocation4], 0  ;;  %s2762_s0 = inlined_call_operand.hbm [shape: bf16[64,64], index: 0, kind: input, shape index: {}]   ;;  %s2763_s1 = inlined_call_operand.hbm [shape: bf16[64,512], index: 1, kind: input, shape index: {}]   ;;  %s2764_s2 = inlined_call_operand.hbm [shape: bf16[128,512], index: 2, kind: input, shape index: {}]   ;;  %s2765_s3 = inlined_call_operand.vmem [shape: f32[1,512], index: 3, kind: input, shape index: {}]   ;;  %s2766_s4 = inlined_call_operand.hbm [shape: bf16[128,128], index: 4, kind: input, shape index: {}]   ;;  %s2767_s5 = inlined_call_operand.vmem [shape: f32[1,128], index: 5, kind: input, shape index: {}]   ;;  %s2768_s6 = inlined_call_operand.hbm [shape: f32[8,128], index: 6, kind: output, shape index: {}]  }
   0x1   :  { %12 = vsyncpa [#allocation7], 0 }
   0x2   :  { %13 = vsyncpa [#allocation10], 0 }
   0x3   :  { %14 = vsyncpa [#allocation5], 0  ;;  %s2144_s21 = smov [#allocation6]  }
   0x4   :  { %s32_s22 = sshll.u32 %s2144_s21, 4  ;;  %s33_s22 = int_to_ptr.vmem [resolvable:$true] %s32_s22 }
   0x5   :  { %s2044_s23 = scalar_lea.vmem %s33_s22, 2048  ;;  %p2049_p1 = scmp.lt.s32.totalorder %s33_s22, %s33_s22 }
   0x6   :  { %p2045_p0 = scmp.ne.s32.totalorder %s33_s22, %s2044_s23  ;;  %p2050_p2 = scmp.lt.s32.totalorder %s2044_s23, %s2044_s23 }
   0x8   :  { %p2051_p3 = por %p2050_p2, %p2049_p1 }
   0xa   :  { %p2052_p4 = pnand %p2051_p3, %p2045_p0 }
   0xc   :  { %2055 = shalt.err (!%p2052_p4)
}
   0xd   :  { %s2145_s24 = smov 256   ;;  %s2146_s25 = smov 16  }
   0xe   :  { %38 = dma.hbm_to_vmem [thread:$0]  %s2763_s1, 2048, %s33_s22, [#allocation7], %s2145_s24, %s2145_s24, %s2146_s25  }
   0xf   :  { %s2147_s28 = smov [#allocation3]  }
  0x10   :  { %s20_s29 = sshll.u32 %s2147_s28, 4  ;;  %s21_s29 = int_to_ptr.vmem [resolvable:$true] %s20_s29 }
  0x11   :  { %s2064_s30 = scalar_lea.vmem %s21_s29, 512  ;;  %p2069_p6 = scmp.lt.s32.totalorder %s21_s29, %s21_s29 }
  0x12   :  { %p2065_p5 = scmp.ne.s32.totalorder %s21_s29, %s2064_s30  ;;  %p2070_p7 = scmp.lt.s32.totalorder %s2064_s30, %s2064_s30 }
  0x14   :  { %p2071_p8 = por %p2070_p7, %p2069_p6 }
  0x16   :  { %p2072_p9 = pnand %p2071_p8, %p2065_p5 }
  0x18   :  { %2075 = shalt.err (!%p2072_p9)
}
  0x19   :  { %s2148_s7 = smov 64   ;;  %s2149_s8 = smov 4  }
  0x1a   :  { %26 = dma.hbm_to_vmem [thread:$0]  %s2762_s0, 512, %s21_s29, [#allocation4], %s2148_s7, %s2148_s7, %s2149_s8  }
  0x1b   :  { %s2150_s11 = smov [#allocation8]   ;;  %s2151_s13 = smov [#allocation9]  }
  0x1c   :  { %s44_s12 = sshll.u32 %s2150_s11, 4  ;;  %s58_s1 = sshll.u32 %s2151_s13, 4  ;;  %s45_s12 = int_to_ptr.vmem [resolvable:$true] %s44_s12  ;;  %s59_s1 = int_to_ptr.vmem [resolvable:$true] %s58_s1 }
  0x1d   :  { %s2084_s14 = scalar_lea.vmem %s45_s12, 4096  ;;  %p2089_p11 = scmp.lt.s32.totalorder %s45_s12, %s45_s12 }
  0x1e   :  { %p2085_p10 = scmp.ne.s32.totalorder %s45_s12, %s2084_s14  ;;  %p2090_p12 = scmp.lt.s32.totalorder %s2084_s14, %s2084_s14 }
  0x20   :  { %p2091_p13 = por %p2090_p12, %p2089_p11 }
  0x22   :  { %p2092_p0 = pnand %p2091_p13, %p2085_p10 }
  0x24   :  { %2095 = shalt.err (!%p2092_p0)
}
  0x25   :  { %50 = dma.hbm_to_vmem [thread:$0]  %s2764_s2, 4096, %s45_s12, [#allocation7], %s2145_s24, %s2145_s24, %s2146_s25  }
  0x26   :  { %s2104_s0 = scalar_lea.vmem %s59_s1, 1024  ;;  %p2109_p2 = scmp.lt.s32.totalorder %s59_s1, %s59_s1 }
  0x27   :  { %p2105_p1 = scmp.ne.s32.totalorder %s59_s1, %s2104_s0  ;;  %p2110_p3 = scmp.lt.s32.totalorder %s2104_s0, %s2104_s0 }
  0x29   :  { %p2111_p4 = por %p2110_p3, %p2109_p2 }
  0x2b   :  { %p2112_p5 = pnand %p2111_p4, %p2105_p1 }
  0x2d   :  { %2115 = shalt.err (!%p2112_p5)
}
  0x2e   :  { %64 = dma.hbm_to_vmem [thread:$0]  %s2766_s4, 1024, %s59_s1, [#allocation10], %s2148_s7, %s2148_s7, %s2149_s8  }
  0x2f   :  { %2136 = dma.done.wait [#allocation4], 512  }
  0x30   :  { %2137 = vsyncadd [#allocation4], 4294966784 }
  0x31   :  { %2138 = dma.done.wait [#allocation7], 6144  }
  0x32   :  { %2139 = vsyncadd [#allocation7], 4294961152 }
  0x33   :  { %2140 = dma.done.wait [#allocation10], 1024  }
  0x34   :  { %2141 = vsyncadd [#allocation10], 4294966272  ;;  %v2769_v0 = vmov 0   ;;  %v1792_v1 = vld [vmem:[#allocation6 + $0x64] ss:$16 sps:$4 sm:$0xff]   ;;  %vm226_vm0 = vcmask 523264   ;;  %v106_v53 = vlaneseq }
  0x35   :  { %271 = vmatprep.mubr.bf16.mxu0 %v2769_v0  ;;  %344 = vmatprep.mubr.bf16.mxu1 %v2769_v0  ;;  %v1794_v2 = vld [vmem:[#allocation6 + $0x6c] ss:$16 sps:$4 sm:$0xff]   ;;  %v1796_v3 = vld [vmem:[#allocation6 + $0x60] ss:$16 sps:$4 sm:$0xff]   ;;  %v1797_v4 = vld [vmem:[#allocation6 + $0x68] ss:$16 sps:$4 sm:$0xff]  }
  0x36   :  { %247 = vmatprep.subr.bf16.mxu0 %v1792_v1  ;;  %320 = vmatprep.subr.bf16.mxu1 %v1794_v2  ;;  %v1798_v5 = vld [vmem:[#allocation6 + $0x44] ss:$16 sps:$4 sm:$0xff]   ;;  %v1800_v6 = vld [vmem:[#allocation6 + $0x4c] ss:$16 sps:$4 sm:$0xff]   ;;  %v1802_v7 = vld [vmem:[#allocation6 + $0x40] ss:$16 sps:$4 sm:$0xff]  }
  0x37   :  { %248 = vmatpush1.bf16.msra.mxu0 %v1796_v3  ;;  %321 = vmatpush1.bf16.msra.mxu1 %v1797_v4  ;;  %v1803_v8 = vld [vmem:[#allocation6 + $0x48] ss:$16 sps:$4 sm:$0xff]   ;;  %v1804_v9 = vld [vmem:[#allocation6 + $0x24] ss:$16 sps:$4 sm:$0xff]   ;;  %v1806_v10 = vld [vmem:[#allocation6 + $0x2c] ss:$16 sps:$4 sm:$0xff]  }
  0x38   :  { %249 = vmatprep.subr.bf16.mxu0 %v1798_v5  ;;  %322 = vmatprep.subr.bf16.mxu1 %v1800_v6  ;;  %v1808_v11 = vld [vmem:[#allocation6 + $0x20] ss:$16 sps:$4 sm:$0xff]   ;;  %v1809_v12 = vld [vmem:[#allocation6 + $0x28] ss:$16 sps:$4 sm:$0xff]   ;;  %v1810_v13 = vld [vmem:[#allocation6 + $0x4] ss:$16 sps:$4 sm:$0xff]  }
  0x39   :  { %v1812_v14 = vld [vmem:[#allocation6 + $0xc] ss:$16 sps:$4 sm:$0xff]   ;;  %v1814_v15 = vld [vmem:[#allocation6] ss:$16 sps:$4 sm:$0xff]   ;;  %v1815_v16 = vld [vmem:[#allocation6 + $0x8] ss:$16 sps:$4 sm:$0xff]  }
  0x3a   :  { %v2211_v17 = vld [vmem:[#allocation8 + $0xe4] ss:$16 sps:$4 sm:$0xff]   ;;  %v2213_v18 = vld [vmem:[#allocation8 + $0xec] ss:$16 sps:$4 sm:$0xff]   ;;  %v2215_v20 = vld [vmem:[#allocation8 + $0xe0] ss:$16 sps:$4 sm:$0xff]  }
  0x3b   :  { %250 = vmatpush1.bf16.msra.mxu0 %v1802_v7  ;;  %323 = vmatpush1.bf16.msra.mxu1 %v1803_v8  ;;  %v1816_v19 = vld [vmem:[#allocation3] sm:$0xff]   ;;  %v2217_v21 = vld [vmem:[#allocation8 + $0xe8] ss:$16 sps:$4 sm:$0xff]   ;;  %v2223_v23 = vld [vmem:[#allocation8 + $0xcc] ss:$16 sps:$4 sm:$0xff]   ;;  %v107_v54 = vshrl.u32 %v106_v53, 7 }
  0x3c   :  { %251 = vmatprep.subr.bf16.mxu0 %v1804_v9  ;;  %324 = vmatprep.subr.bf16.mxu1 %v1806_v10  ;;  %v2219_v22 = vld [vmem:[#allocation8 + $0xc4] ss:$16 sps:$4 sm:$0xff]   ;;  %v2227_v24 = vld [vmem:[#allocation8 + $0xc0] ss:$16 sps:$4 sm:$0xff]   ;;  %v2231_v25 = vld [vmem:[#allocation8 + $0xc8] ss:$16 sps:$4 sm:$0xff]  }
  0x3d   :  { %v2233_v26 = vld [vmem:[#allocation8 + $0xa4] ss:$16 sps:$4 sm:$0xff]   ;;  %v2237_v27 = vld [vmem:[#allocation8 + $0xac] ss:$16 sps:$4 sm:$0xff]   ;;  %v2241_v29 = vld [vmem:[#allocation8 + $0xa0] ss:$16 sps:$4 sm:$0xff]  }
  0x3e   :  { %v1829_v28 = vld [vmem:[#allocation3 + $0x8] sm:$0xff]   ;;  %v2247_v31 = vld [vmem:[#allocation8 + $0x84] ss:$16 sps:$4 sm:$0xff]   ;;  %v2255_v33 = vld [vmem:[#allocation8 + $0x80] ss:$16 sps:$4 sm:$0xff]   ;;  %v116_v55 = vsub.s32 2, %v107_v54 }
  0x3f   :  { %252 = vmatpush1.bf16.msra.mxu0 %v1808_v11  ;;  %325 = vmatpush1.bf16.msra.mxu1 %v1809_v12  ;;  %v2243_v30 = vld [vmem:[#allocation8 + $0xa8] ss:$16 sps:$4 sm:$0xff]   ;;  %v2251_v32 = vld [vmem:[#allocation8 + $0x8c] ss:$16 sps:$4 sm:$0xff]   ;;  %v2263_v35 = vld [vmem:[#allocation8 + $0x64] ss:$16 sps:$4 sm:$0xff]  }
  0x40   :  { %253 = vmatprep.subr.bf16.mxu0 %v1810_v13  ;;  %326 = vmatprep.subr.bf16.mxu1 %v1812_v14  ;;  %v2259_v34 = vld [vmem:[#allocation8 + $0x88] ss:$16 sps:$4 sm:$0xff]   ;;  %v2265_v36 = vld [vmem:[#allocation8 + $0x6c] ss:$16 sps:$4 sm:$0xff]   ;;  %v1842_v37 = vld [vmem:[#allocation3 + $0x10] sm:$0xff]   ;;  %v108_v56 = vsub.s32 0, %v107_v54 }
  0x41   :  { %v2269_v38 = vld [vmem:[#allocation8 + $0x60] ss:$16 sps:$4 sm:$0xff]   ;;  %v2273_v39 = vld [vmem:[#allocation8 + $0x68] ss:$16 sps:$4 sm:$0xff]   ;;  %v2275_v40 = vld [vmem:[#allocation8 + $0x44] ss:$16 sps:$4 sm:$0xff]  }
  0x42   :  { %v2279_v41 = vld [vmem:[#allocation8 + $0x4c] ss:$16 sps:$4 sm:$0xff]   ;;  %v2283_v42 = vld [vmem:[#allocation8 + $0x40] ss:$16 sps:$4 sm:$0xff]   ;;  %v2285_v43 = vld [vmem:[#allocation8 + $0x48] ss:$16 sps:$4 sm:$0xff]  }
  0x43   :  { %254 = vmatpush1.bf16.msra.mxu0 %v1814_v15  ;;  %327 = vmatpush1.bf16.msra.mxu1 %v1815_v16  ;;  %v2287_v44 = vld [vmem:[#allocation8 + $0x24] ss:$16 sps:$4 sm:$0xff]   ;;  %v2291_v45 = vld [vmem:[#allocation8 + $0x2c] ss:$16 sps:$4 sm:$0xff]   ;;  %v2297_v47 = vld [vmem:[#allocation8 + $0x20] ss:$16 sps:$4 sm:$0xff]  }
  0x44   :  { %613 = vmatprep.subr.bf16.mxu0 %v2211_v17  ;;  %654 = vmatprep.subr.bf16.mxu1 %v2213_v18  ;;  %v1855_v46 = vld [vmem:[#allocation3 + $0x18] sm:$0xff]   ;;  %v2301_v49 = vld [vmem:[#allocation8 + $0x4] ss:$16 sps:$4 sm:$0xff]   ;;  %v2313_v51 = vld [vmem:[#allocation8] ss:$16 sps:$4 sm:$0xff]   ;;  %v120_v57 = vsub.s32 3, %v107_v54 }
  0x45   :  { %v2299_v48 = vld [vmem:[#allocation8 + $0x28] ss:$16 sps:$4 sm:$0xff]   ;;  %v2307_v50 = vld [vmem:[#allocation8 + $0xc] ss:$16 sps:$4 sm:$0xff]   ;;  %v104_v58 = vld [vmem:[%s2765_s3] sm:$0xf] }
  0x46   :  { %1678 = vmatmul.mubr.msk.bf16.vlgmr.msra.gmra.mxu0 %vm226_vm0, %v1816_v19  ;;  %1682 = vmatmul.mubr.msk.bf16.vlgmr.msra.gmra.mxu1 %vm226_vm0, %v1816_v19  ;;  %v2315_v52 = vld [vmem:[#allocation8 + $0x8] ss:$16 sps:$4 sm:$0xff]   ;;  %v2368_v61 = vrot.slane %v104_v58, %v116_v55  ;;  %v112_v62 = vsub.s32 1, %v107_v54  ;;  %v109_v2 = vrot.slane %v104_v58, %v108_v56  ;;  %v2374_v3 = vrot.slane %v104_v58, %v120_v57  ;;  %s2155_s20 = smov [#allocation11]  }
  0x47   :  { %614 = vmatpush1.bf16.msra.mxu0 %v2215_v20  ;;  %655 = vmatpush1.bf16.msra.mxu1 %v2217_v21  ;;  %vm2154_vm1 = vmmov 0   ;;  %s1647_s21 = sshll.u32 %s2155_s20, 4  ;;  %s1648_s21 = int_to_ptr.vmem [resolvable:$true] %s1647_s21 }
  0x48   :  { %615 = vmatprep.subr.bf16.mxu0 %v2219_v22  ;;  %656 = vmatprep.subr.bf16.mxu1 %v2223_v23  ;;  %v113_v6 = vrot.slane %v104_v58, %v112_v62  ;;  %s2116_s22 = scalar_lea.vmem %s1648_s21, 128  ;;  %p2121_p7 = scmp.lt.s32.totalorder %s1648_s21, %s1648_s21 }
  0x49   :  { %281 = vmatprep.mubr.bf16.mxu0 %v2769_v0  ;;  %354 = vmatprep.mubr.bf16.mxu1 %v2769_v0  ;;  %p2117_p6 = scmp.ne.s32.totalorder %s1648_s21, %s2116_s22  ;;  %p2122_p8 = scmp.lt.s32.totalorder %s2116_s22, %s2116_s22 }
  0x4b   :  { %616 = vmatpush1.bf16.msra.mxu0 %v2227_v24  ;;  %657 = vmatpush1.bf16.msra.mxu1 %v2231_v25  ;;  %p2123_p9 = por %p2122_p8, %p2121_p7 }
  0x4c   :  { %617 = vmatprep.subr.bf16.mxu0 %v2233_v26  ;;  %658 = vmatprep.subr.bf16.mxu1 %v2237_v27 }
  0x4d   :  { %p2124_p10 = pnand %p2123_p9, %p2117_p6 }
  0x4e   :  { %1679 = vmatmul.mubr.msk.bf16.gmra.mxu0 %vm226_vm0, %v1829_v28  ;;  %1683 = vmatmul.mubr.msk.bf16.gmra.mxu1 %vm226_vm0, %v1829_v28 }
  0x4f   :  { %618 = vmatpush1.bf16.msra.mxu0 %v2241_v29  ;;  %659 = vmatpush1.bf16.msra.mxu1 %v2243_v30 }
  0x50   :  { %619 = vmatprep.subr.bf16.mxu0 %v2247_v31  ;;  %660 = vmatprep.subr.bf16.mxu1 %v2251_v32 }
  0x51   :  { %291 = vmatprep.mubr.bf16.mxu0 %v2769_v0  ;;  %364 = vmatprep.mubr.bf16.mxu1 %v2769_v0 }
  0x53   :  { %620 = vmatpush1.bf16.msra.mxu0 %v2255_v33  ;;  %661 = vmatpush1.bf16.msra.mxu1 %v2259_v34 }
  0x54   :  { %621 = vmatprep.subr.bf16.mxu0 %v2263_v35  ;;  %662 = vmatprep.subr.bf16.mxu1 %v2265_v36 }
  0x56   :  { %1680 = vmatmul.mubr.msk.bf16.gmra.mxu0 %vm226_vm0, %v1842_v37  ;;  %1684 = vmatmul.mubr.msk.bf16.gmra.mxu1 %vm226_vm0, %v1842_v37 }
  0x57   :  { %622 = vmatpush1.bf16.msra.mxu0 %v2269_v38  ;;  %663 = vmatpush1.bf16.msra.mxu1 %v2273_v39 }
  0x58   :  { %623 = vmatprep.subr.bf16.mxu0 %v2275_v40  ;;  %664 = vmatprep.subr.bf16.mxu1 %v2279_v41 }
  0x59   :  { %301 = vmatprep.mubr.bf16.mxu0 %v2769_v0  ;;  %374 = vmatprep.mubr.bf16.mxu1 %v2769_v0 }
  0x5b   :  { %624 = vmatpush1.bf16.msra.mxu0 %v2283_v42  ;;  %665 = vmatpush1.bf16.msra.mxu1 %v2285_v43 }
  0x5c   :  { %625 = vmatprep.subr.bf16.mxu0 %v2287_v44  ;;  %666 = vmatprep.subr.bf16.mxu1 %v2291_v45 }
  0x5e   :  { %1681 = vmatmul.mubr.msk.bf16.gmra.mxu0 %vm226_vm0, %v1855_v46  ;;  %1685 = vmatmul.mubr.msk.bf16.gmra.mxu1 %vm226_vm0, %v1855_v46 }
  0x5f   :  { %626 = vmatpush1.bf16.msra.mxu0 %v2297_v47  ;;  %667 = vmatpush1.bf16.msra.mxu1 %v2299_v48 }
  0x60   :  { %627 = vmatprep.subr.bf16.mxu0 %v2301_v49  ;;  %668 = vmatprep.subr.bf16.mxu1 %v2307_v50 }
  0x61   :  { %645 = vmatprep.mubr.bf16.mxu0 %v2769_v0  ;;  %686 = vmatprep.mubr.bf16.mxu1 %v2769_v0 }
  0x63   :  { %628 = vmatpush1.bf16.msra.mxu0 %v2313_v51  ;;  %669 = vmatpush1.bf16.msra.mxu1 %v2315_v52 }
  0x64   :  { %728 = vmatprep.subr.bf16.mxu0 %v2211_v17  ;;  %769 = vmatprep.subr.bf16.mxu1 %v2213_v18 }
  0x66   :  { %646 = vmatmul.mubr.bf16.vlgmr.msra.gmra.mxu0 %v2769_v0  ;;  %687 = vmatmul.mubr.bf16.vlgmr.msra.gmra.mxu1 %v2769_v0 }
  0x67   :  { %729 = vmatpush1.bf16.msra.mxu0 %v2215_v20  ;;  %770 = vmatpush1.bf16.msra.mxu1 %v2217_v21 }
  0x68   :  { %730 = vmatprep.subr.bf16.mxu0 %v2219_v22  ;;  %771 = vmatprep.subr.bf16.mxu1 %v2223_v23 }
  0x69   :  { %760 = vmatprep.mubr.bf16.mxu0 %v2769_v0  ;;  %801 = vmatprep.mubr.bf16.mxu1 %v2769_v0 }
  0x6b   :  { %731 = vmatpush1.bf16.msra.mxu0 %v2227_v24  ;;  %772 = vmatpush1.bf16.msra.mxu1 %v2231_v25 }
  0x6c   :  { %732 = vmatprep.subr.bf16.mxu0 %v2233_v26  ;;  %773 = vmatprep.subr.bf16.mxu1 %v2237_v27 }
  0x6f   :  { %733 = vmatpush1.bf16.msra.mxu0 %v2241_v29  ;;  %774 = vmatpush1.bf16.msra.mxu1 %v2243_v30 }
  0x70   :  { %734 = vmatprep.subr.bf16.mxu0 %v2247_v31  ;;  %775 = vmatprep.subr.bf16.mxu1 %v2251_v32 }
  0x73   :  { %735 = vmatpush1.bf16.msra.mxu0 %v2255_v33  ;;  %776 = vmatpush1.bf16.msra.mxu1 %v2259_v34 }
  0x74   :  { %736 = vmatprep.subr.bf16.mxu0 %v2263_v35  ;;  %777 = vmatprep.subr.bf16.mxu1 %v2265_v36 }
  0x77   :  { %737 = vmatpush1.bf16.msra.mxu0 %v2269_v38  ;;  %778 = vmatpush1.bf16.msra.mxu1 %v2273_v39 }
  0x78   :  { %738 = vmatprep.subr.bf16.mxu0 %v2275_v40  ;;  %779 = vmatprep.subr.bf16.mxu1 %v2279_v41 }
  0x7b   :  { %739 = vmatpush1.bf16.msra.mxu0 %v2283_v42  ;;  %780 = vmatpush1.bf16.msra.mxu1 %v2285_v43 }
  0x7c   :  { %740 = vmatprep.subr.bf16.mxu0 %v2287_v44  ;;  %781 = vmatprep.subr.bf16.mxu1 %v2291_v45 }
  0x7f   :  { %741 = vmatpush1.bf16.msra.mxu0 %v2297_v47  ;;  %782 = vmatpush1.bf16.msra.mxu1 %v2299_v48 }
  0x80   :  { %742 = vmatprep.subr.bf16.mxu0 %v2301_v49  ;;  %783 = vmatprep.subr.bf16.mxu1 %v2307_v50 }
  0x83   :  { %743 = vmatpush1.bf16.msra.mxu0 %v2313_v51  ;;  %784 = vmatpush1.bf16.msra.mxu1 %v2315_v52 }
  0x84   :  { %843 = vmatprep.subr.bf16.mxu0 %v2211_v17  ;;  %884 = vmatprep.subr.bf16.mxu1 %v2213_v18 }
 0x106   :  { %v2364_v59 = vpop.f32.mrf.mxu0  ;;  %v2366_v60 = vpop.f32.mrf.mxu1 }
 0x108   :  { %v2370_v63 = vpop.f32.mrf.mxu0  ;;  %v2372_v1 = vpop.f32.mrf.mxu1 }
 0x10a   :  { %v277_v4 = vpop.f32.mrf.mxu0  ;;  %v350_v5 = vpop.f32.mrf.mxu1 }
 0x10b   :  { %v2376_v7 = vadd.f32 %v277_v4, %v109_v2  ;;  %v2379_v8 = vadd.f32 %v350_v5, %v2368_v61 }
 0x10c   :  { %v279_v9 = vpop.f32.mrf.mxu0  ;;  %v352_v10 = vpop.f32.mrf.mxu1 }
 0x10d   :  { %v2381_v11 = vadd.f32 %v279_v9, %v113_v6  ;;  %v2384_v12 = vadd.f32 %v352_v10, %v2374_v3 }
 0x10e   :  { %v283_v13 = vpop.f32.mrf.mxu0  ;;  %v356_v14 = vpop.f32.mrf.mxu1 }
 0x10f   :  { %v2386_v15 = vadd.f32 %v283_v13, %v109_v2  ;;  %v2389_v16 = vadd.f32 %v356_v14, %v2368_v61 }
 0x110   :  { %v285_v19 = vpop.f32.mrf.mxu0  ;;  %v358_v28 = vpop.f32.mrf.mxu1 }
 0x111   :  { %v2391_v37 = vadd.f32 %v285_v19, %v113_v6  ;;  %v2394_v46 = vadd.f32 %v358_v28, %v2374_v3 }
 0x112   :  { %v287_v53 = vpop.f32.mrf.mxu0  ;;  %v360_v54 = vpop.f32.mrf.mxu1 }
 0x113   :  { %2771 = vst [vmem:[#allocation16_spill] sm:$0xff] %v2394_v46  ;;  %v2396_v55 = vadd.f32 %v287_v53, %v109_v2  ;;  %v2399_v56 = vadd.f32 %v360_v54, %v2368_v61 }
 0x114   :  { %v289_v57 = vpop.f32.mrf.mxu0  ;;  %v362_v58 = vpop.f32.mrf.mxu1 }
 0x115   :  { %2772 = vst [vmem:[#allocation17_spill] sm:$0xff] %v2396_v55  ;;  %2773 = vst [vmem:[#allocation18_spill] sm:$0xff] %v2399_v56  ;;  %v2401_v62 = vadd.f32 %v289_v57, %v113_v6  ;;  %v2404_v4 = vadd.f32 %v362_v58, %v2374_v3 }
 0x116   :  { %v293_v5 = vpop.f32.mrf.mxu0  ;;  %v366_v9 = vpop.f32.mrf.mxu1 }
 0x117   :  { %2774 = vst [vmem:[#allocation19_spill] sm:$0xff] %v2401_v62  ;;  %2775 = vst [vmem:[#allocation20_spill] sm:$0xff] %v2404_v4  ;;  %v2406_v10 = vadd.f32 %v293_v5, %v109_v2  ;;  %v2409_v13 = vadd.f32 %v366_v9, %v2368_v61 }
 0x118   :  { %v295_v14 = vpop.f32.mrf.mxu0  ;;  %v368_v19 = vpop.f32.mrf.mxu1 }
 0x119   :  { %2776 = vst [vmem:[#allocation21_spill] sm:$0xff] %v2406_v10  ;;  %2777 = vst [vmem:[#allocation22_spill] sm:$0xff] %v2409_v13  ;;  %v2411_v28 = vadd.f32 %v295_v14, %v113_v6  ;;  %v2414_v53 = vadd.f32 %v368_v19, %v2374_v3 }
 0x11a   :  { %v297_v54 = vpop.f32.mrf.mxu0  ;;  %v370_v57 = vpop.f32.mrf.mxu1 }
 0x11b   :  { %2778 = vst [vmem:[#allocation23_spill] sm:$0xff] %v2411_v28  ;;  %2779 = vst [vmem:[#allocation24_spill] sm:$0xff] %v2414_v53  ;;  %v2416_v0 = vadd.f32 %v297_v54, %v109_v2  ;;  %v2419_v58 = vadd.f32 %v370_v57, %v2368_v61 }
 0x11c   :  { %v299_v4 = vpop.f32.mrf.mxu0  ;;  %v372_v5 = vpop.f32.mrf.mxu1 }
 0x11d   :  { %2780 = vst [vmem:[#allocation25_spill] sm:$0xff] %v2416_v0  ;;  %2781 = vst [vmem:[#allocation26_spill] sm:$0xff] %v2419_v58  ;;  %v2421_v10 = vadd.f32 %v299_v4, %v113_v6  ;;  %v2424_v9 = vadd.f32 %v372_v5, %v2374_v3 }
 0x11e   :  { %v303_v13 = vpop.f32.mrf.mxu0  ;;  %v376_v14 = vpop.f32.mrf.mxu1 }
 0x11f   :  { %2782 = vst [vmem:[#allocation27_spill] sm:$0xff] %v2421_v10  ;;  %2783 = vst [vmem:[#allocation28_spill] sm:$0xff] %v2424_v9  ;;  %v2426_v28 = vadd.f32 %v303_v13, %v109_v2  ;;  %v2429_v19 = vadd.f32 %v376_v14, %v2368_v61 }
 0x120   :  { %v305_v53 = vpop.f32.mrf.mxu0  ;;  %v378_v54 = vpop.f32.mrf.mxu1 }
 0x121   :  { %2784 = vst [vmem:[#allocation29_spill] sm:$0xff] %v2426_v28  ;;  %2785 = vst [vmem:[#allocation30_spill] sm:$0xff] %v2429_v19  ;;  %v2431_v0 = vadd.f32 %v305_v53, %v113_v6  ;;  %v2434_v57 = vadd.f32 %v378_v54, %v2374_v3  ;;  %v274_v28 = vadd.f32 %v2364_v59, %v109_v2 }
 0x122   :  { %v307_v58 = vpop.f32.mrf.mxu0  ;;  %v380_v4 = vpop.f32.mrf.mxu1  ;;  %v276_v54 = vadd.f32 %v2370_v63, %v113_v6 }
 0x123   :  { %2786 = vst [vmem:[#allocation31_spill] sm:$0xff] %v2431_v0  ;;  %2787 = vst [vmem:[#allocation32_spill] sm:$0xff] %v2434_v57  ;;  %v2436_v10 = vadd.f32 %v307_v58, %v109_v2  ;;  %v2439_v5 = vadd.f32 %v380_v4, %v2368_v61  ;;  %v347_v2 = vadd.f32 %v2366_v60, %v2368_v61 }
 0x124   :  { %v309_v9 = vpop.f32.mrf.mxu0  ;;  %v382_v13 = vpop.f32.mrf.mxu1 }
 0x125   :  { %2788 = vst [vmem:[#allocation33_spill] sm:$0xff] %v2436_v10  ;;  %2789 = vst [vmem:[#allocation34_spill] sm:$0xff] %v2439_v5  ;;  %v2442_v14 = vadd.f32 %v309_v9, %v113_v6  ;;  %v2445_v19 = vadd.f32 %v382_v13, %v2374_v3  ;;  %v349_v13 = vadd.f32 %v2372_v1, %v2374_v3 }
 0x126   :  { %v647_v53 = vpop.f32.mrf.mxu0  ;;  %v688_v0 = vpop.f32.mrf.mxu1 }
 0x127   :  { %v695_v57 = vadd.f32 %v647_v53, %v274_v28  ;;  %v697_v9 = vadd.f32 %v688_v0, %v347_v2 }
 0x128   :  { %v649_v56 = vpop.f32.mrf.mxu0  ;;  %v690_v58 = vpop.f32.mrf.mxu1 }
 0x129   :  { %v1718_v10 = vmul.f32 -1.442695, %v695_v57  ;;  %v696_v62 = vadd.f32 %v649_v56, %v276_v54  ;;  %v1720_v63 = vmul.f32 -1.442695, %v697_v9  ;;  %v698_v28 = vadd.f32 %v690_v58, %v349_v13 }
 0x12a   :  { %v651_v4 = vpop.f32.mrf.mxu0  ;;  %v692_v5 = vpop.f32.mrf.mxu1 }
 0x12b   :  { %1876 = vpow2.f32 %v1718_v10  ;;  %v1719_v55 = vmul.f32 -1.442695, %v696_v62  ;;  %v2790_v4 = vmov 0  }
 0x12c   :  { %v652_v46 = vpop.f32.mrf.mxu0  ;;  %v693_v59 = vpop.f32.mrf.mxu1 }
 0x12d   :  { %1878 = vpow2.f32 %v1719_v55 }
 0x12e   :  { %1880 = vpow2.f32 %v1720_v63 }
 0x138   :  { %v1877_v6 = vpop.eup %1876 }
 0x139   :  { %v708_v53 = vadd.f32 1.0, %v1877_v6 }
 0x13a   :  { %v1879_v57 = vpop.eup %1878 }
 0x13b   :  { %1882 = vrcp.f32 %v708_v53  ;;  %v709_v56 = vadd.f32 1.0, %v1879_v57  ;;  %v1881_v46 = vpop.eup %1880 }
 0x13c   :  { %1884 = vtanh.f32 %v698_v28  ;;  %v710_v5 = vadd.f32 1.0, %v1881_v46 }
 0x13d   :  { %1886 = vrcp.f32 %v709_v56 }
 0x13e   :  { %1888 = vrcp.f32 %v710_v5 }
 0x148   :  { %v1883_v62 = vpop.eup %1882 }
 0x149   :  { %v1885_v55 = vpop.eup %1884 }
 0x14a   :  { %v1887_v10 = vpop.eup %1886  ;;  %v719_v0 = vmul.f32 %v1885_v55, %v1883_v62 }
 0x14b   :  { %v718_v60 = vmul.f32 0.0, %v1887_v10  ;;  %v1889_v1 = vpop.eup %1888 }
 0x14d   :  { %v2452_v61 = vadd.f32 %v719_v0, %v718_v60 }
 0x14f   :  { %1890 = vtanh.f32 %v2452_v61 }
 0x15c   :  { %v1891_v3 = vpop.eup %1890 }
 0x15d   :  { %v722_v54 = vmul.f32 %v1891_v3, %v1889_v1 }
 0x15f   :  { %v727_v58 = vpack.c.bf16 %v722_v54, %v722_v54 }
 0x161   :  { %761 = vmatmul.mubr.bf16.vlgmr.msra.gmra.mxu0 %v727_v58  ;;  %802 = vmatmul.mubr.bf16.vlgmr.msra.gmra.mxu1 %v727_v58 }
 0x162   :  { %844 = vmatpush1.bf16.msra.mxu0 %v2215_v20  ;;  %885 = vmatpush1.bf16.msra.mxu1 %v2217_v21 }
 0x163   :  { %845 = vmatprep.subr.bf16.mxu0 %v2219_v22  ;;  %886 = vmatprep.subr.bf16.mxu1 %v2223_v23 }
 0x164   :  { %875 = vmatprep.mubr.bf16.mxu0 %v2790_v4  ;;  %916 = vmatprep.mubr.bf16.mxu1 %v2790_v4 }
 0x166   :  { %846 = vmatpush1.bf16.msra.mxu0 %v2227_v24  ;;  %887 = vmatpush1.bf16.msra.mxu1 %v2231_v25 }
 0x167   :  { %847 = vmatprep.subr.bf16.mxu0 %v2233_v26  ;;  %888 = vmatprep.subr.bf16.mxu1 %v2237_v27 }
 0x16a   :  { %848 = vmatpush1.bf16.msra.mxu0 %v2241_v29  ;;  %889 = vmatpush1.bf16.msra.mxu1 %v2243_v30 }
 0x16b   :  { %849 = vmatprep.subr.bf16.mxu0 %v2247_v31  ;;  %890 = vmatprep.subr.bf16.mxu1 %v2251_v32 }
 0x16e   :  { %850 = vmatpush1.bf16.msra.mxu0 %v2255_v33  ;;  %891 = vmatpush1.bf16.msra.mxu1 %v2259_v34 }
 0x16f   :  { %851 = vmatprep.subr.bf16.mxu0 %v2263_v35  ;;  %892 = vmatprep.subr.bf16.mxu1 %v2265_v36 }
 0x172   :  { %852 = vmatpush1.bf16.msra.mxu0 %v2269_v38  ;;  %893 = vmatpush1.bf16.msra.mxu1 %v2273_v39 }
 0x173   :  { %853 = vmatprep.subr.bf16.mxu0 %v2275_v40  ;;  %894 = vmatprep.subr.bf16.mxu1 %v2279_v41 }
 0x176   :  { %854 = vmatpush1.bf16.msra.mxu0 %v2283_v42  ;;  %895 = vmatpush1.bf16.msra.mxu1 %v2285_v43 }
 0x177   :  { %855 = vmatprep.subr.bf16.mxu0 %v2287_v44  ;;  %896 = vmatprep.subr.bf16.mxu1 %v2291_v45 }
 0x17a   :  { %856 = vmatpush1.bf16.msra.mxu0 %v2297_v47  ;;  %897 = vmatpush1.bf16.msra.mxu1 %v2299_v48 }
 0x17b   :  { %857 = vmatprep.subr.bf16.mxu0 %v2301_v49  ;;  %898 = vmatprep.subr.bf16.mxu1 %v2307_v50 }
 0x17e   :  { %858 = vmatpush1.bf16.msra.mxu0 %v2313_v51  ;;  %899 = vmatpush1.bf16.msra.mxu1 %v2315_v52 }
 0x17f   :  { %958 = vmatprep.subr.bf16.mxu0 %v2211_v17  ;;  %999 = vmatprep.subr.bf16.mxu1 %v2213_v18 }
 0x221   :  { %v762_v59 = vpop.f32.mrf.mxu0  ;;  %v803_v2 = vpop.f32.mrf.mxu1 }
 0x222   :  { %v810_v9 = vadd.f32 %v762_v59, %v2376_v7  ;;  %v812_v55 = vadd.f32 %v803_v2, %v2379_v8 }
 0x223   :  { %v764_v13 = vpop.f32.mrf.mxu0  ;;  %v805_v63 = vpop.f32.mrf.mxu1 }
 0x224   :  { %v1721_v6 = vmul.f32 -1.442695, %v810_v9  ;;  %v811_v28 = vadd.f32 %v764_v13, %v2381_v11  ;;  %v1723_v10 = vmul.f32 -1.442695, %v812_v55  ;;  %v813_v5 = vadd.f32 %v805_v63, %v2384_v12 }
 0x225   :  { %v766_v53 = vpop.f32.mrf.mxu0  ;;  %v807_v57 = vpop.f32.mrf.mxu1 }
 0x226   :  { %1892 = vpow2.f32 %v1721_v6  ;;  %v1722_v56 = vmul.f32 -1.442695, %v811_v28 }
 0x227   :  { %v767_v46 = vpop.f32.mrf.mxu0  ;;  %v808_v62 = vpop.f32.mrf.mxu1 }
 0x228   :  { %1894 = vpow2.f32 %v1722_v56 }
 0x229   :  { %1896 = vpow2.f32 %v1723_v10 }
 0x22a   :  { %1898 = vtanh.f32 %v813_v5 }
 0x233   :  { %v1893_v60 = vpop.eup %1892 }
 0x234   :  { %v823_v0 = vadd.f32 1.0, %v1893_v60 }
 0x235   :  { %v1895_v7 = vpop.eup %1894 }
 0x236   :  { %1900 = vrcp.f32 %v823_v0  ;;  %v824_v1 = vadd.f32 1.0, %v1895_v7  ;;  %v1897_v11 = vpop.eup %1896 }
 0x237   :  { %v1899_v3 = vpop.eup %1898  ;;  %v825_v9 = vadd.f32 1.0, %v1897_v11  ;;  %v2791_v11 = vld [vmem:[#allocation16_spill] sm:$0xff] }
 0x238   :  { %1902 = vrcp.f32 %v824_v1 }
 0x239   :  { %1904 = vrcp.f32 %v825_v9 }
 0x243   :  { %v1901_v54 = vpop.eup %1900 }
 0x244   :  { %v834_v58 = vmul.f32 %v1901_v54, %v1899_v3 }
 0x245   :  { %v1903_v59 = vpop.eup %1902 }
 0x246   :  { %v833_v13 = vmul.f32 %v1903_v59, %v2452_v61  ;;  %v1905_v12 = vpop.eup %1904 }
 0x248   :  { %v2494_v8 = vadd.f32 %v834_v58, %v833_v13 }
 0x24a   :  { %1906 = vtanh.f32 %v2494_v8 }
 0x257   :  { %v1907_v2 = vpop.eup %1906 }
 0x258   :  { %v837_v63 = vmul.f32 %v1907_v2, %v1905_v12 }
 0x25a   :  { %v842_v6 = vpack.c.bf16 %v837_v63, %v837_v63 }
 0x25c   :  { %876 = vmatmul.mubr.bf16.vlgmr.msra.gmra.mxu0 %v842_v6  ;;  %917 = vmatmul.mubr.bf16.vlgmr.msra.gmra.mxu1 %v842_v6 }
 0x25d   :  { %959 = vmatpush1.bf16.msra.mxu0 %v2215_v20  ;;  %1000 = vmatpush1.bf16.msra.mxu1 %v2217_v21 }
 0x25e   :  { %960 = vmatprep.subr.bf16.mxu0 %v2219_v22  ;;  %1001 = vmatprep.subr.bf16.mxu1 %v2223_v23 }
 0x25f   :  { %990 = vmatprep.mubr.bf16.mxu0 %v2790_v4  ;;  %1031 = vmatprep.mubr.bf16.mxu1 %v2790_v4 }
 0x261   :  { %961 = vmatpush1.bf16.msra.mxu0 %v2227_v24  ;;  %1002 = vmatpush1.bf16.msra.mxu1 %v2231_v25 }
 0x262   :  { %962 = vmatprep.subr.bf16.mxu0 %v2233_v26  ;;  %1003 = vmatprep.subr.bf16.mxu1 %v2237_v27 }
 0x265   :  { %963 = vmatpush1.bf16.msra.mxu0 %v2241_v29  ;;  %1004 = vmatpush1.bf16.msra.mxu1 %v2243_v30 }
 0x266   :  { %964 = vmatprep.subr.bf16.mxu0 %v2247_v31  ;;  %1005 = vmatprep.subr.bf16.mxu1 %v2251_v32 }
 0x269   :  { %965 = vmatpush1.bf16.msra.mxu0 %v2255_v33  ;;  %1006 = vmatpush1.bf16.msra.mxu1 %v2259_v34 }
 0x26a   :  { %966 = vmatprep.subr.bf16.mxu0 %v2263_v35  ;;  %1007 = vmatprep.subr.bf16.mxu1 %v2265_v36 }
 0x26d   :  { %967 = vmatpush1.bf16.msra.mxu0 %v2269_v38  ;;  %1008 = vmatpush1.bf16.msra.mxu1 %v2273_v39 }
 0x26e   :  { %968 = vmatprep.subr.bf16.mxu0 %v2275_v40  ;;  %1009 = vmatprep.subr.bf16.mxu1 %v2279_v41 }
 0x271   :  { %969 = vmatpush1.bf16.msra.mxu0 %v2283_v42  ;;  %1010 = vmatpush1.bf16.msra.mxu1 %v2285_v43 }
 0x272   :  { %970 = vmatprep.subr.bf16.mxu0 %v2287_v44  ;;  %1011 = vmatprep.subr.bf16.mxu1 %v2291_v45 }
 0x275   :  { %971 = vmatpush1.bf16.msra.mxu0 %v2297_v47  ;;  %1012 = vmatpush1.bf16.msra.mxu1 %v2299_v48 }
 0x276   :  { %972 = vmatprep.subr.bf16.mxu0 %v2301_v49  ;;  %1013 = vmatprep.subr.bf16.mxu1 %v2307_v50 }
 0x279   :  { %973 = vmatpush1.bf16.msra.mxu0 %v2313_v51  ;;  %1014 = vmatpush1.bf16.msra.mxu1 %v2315_v52 }
 0x27a   :  { %1073 = vmatprep.subr.bf16.mxu0 %v2211_v17  ;;  %1114 = vmatprep.subr.bf16.mxu1 %v2213_v18 }
 0x31c   :  { %v877_v61 = vpop.f32.mrf.mxu0  ;;  %v918_v28 = vpop.f32.mrf.mxu1 }
 0x31d   :  { %v925_v53 = vadd.f32 %v877_v61, %v2386_v15  ;;  %v927_v7 = vadd.f32 %v918_v28, %v2389_v16 }
 0x31e   :  { %v879_v57 = vpop.f32.mrf.mxu0  ;;  %v920_v56 = vpop.f32.mrf.mxu1 }
 0x31f   :  { %v1724_v46 = vmul.f32 -1.442695, %v925_v53  ;;  %v926_v62 = vadd.f32 %v879_v57, %v2391_v37  ;;  %v1726_v1 = vmul.f32 -1.442695, %v927_v7  ;;  %v928_v3 = vadd.f32 %v920_v56, %v2791_v11 }
 0x320   :  { %v881_v55 = vpop.f32.mrf.mxu0  ;;  %v922_v10 = vpop.f32.mrf.mxu1 }
 0x321   :  { %1908 = vpow2.f32 %v1724_v46  ;;  %v1725_v5 = vmul.f32 -1.442695, %v926_v62  ;;  %v2792_v46 = vld [vmem:[#allocation17_spill] sm:$0xff] }
 0x322   :  { %v882_v60 = vpop.f32.mrf.mxu0  ;;  %v923_v0 = vpop.f32.mrf.mxu1 }
 0x323   :  { %1910 = vpow2.f32 %v1725_v5  ;;  %v2793_v60 = vld [vmem:[#allocation19_spill] sm:$0xff] }
 0x324   :  { %1912 = vpow2.f32 %v1726_v1 }
 0x325   :  { %1914 = vtanh.f32 %v928_v3 }
 0x32e   :  { %v1909_v54 = vpop.eup %1908 }
 0x32f   :  { %v938_v58 = vadd.f32 1.0, %v1909_v54 }
 0x330   :  { %v1911_v15 = vpop.eup %1910 }
 0x331   :  { %1916 = vrcp.f32 %v938_v58  ;;  %v939_v59 = vadd.f32 1.0, %v1911_v15  ;;  %v1913_v37 = vpop.eup %1912  ;;  %v2794_v58 = vld [vmem:[#allocation18_spill] sm:$0xff] }
 0x332   :  { %v1915_v9 = vpop.eup %1914  ;;  %v940_v63 = vadd.f32 1.0, %v1913_v37 }
 0x333   :  { %1918 = vrcp.f32 %v939_v59 }
 0x334   :  { %1920 = vrcp.f32 %v940_v63 }
 0x33e   :  { %v1917_v13 = vpop.eup %1916 }
 0x33f   :  { %v949_v12 = vmul.f32 %v1917_v13, %v1915_v9 }
 0x340   :  { %v1919_v2 = vpop.eup %1918 }
 0x341   :  { %v948_v6 = vmul.f32 %v1919_v2, %v2494_v8  ;;  %v1921_v61 = vpop.eup %1920 }
 0x343   :  { %v2536_v16 = vadd.f32 %v949_v12, %v948_v6 }
 0x345   :  { %1922 = vtanh.f32 %v2536_v16 }
 0x352   :  { %v1923_v28 = vpop.eup %1922 }
 0x353   :  { %v952_v53 = vmul.f32 %v1923_v28, %v1921_v61 }
 0x355   :  { %v957_v57 = vpack.c.bf16 %v952_v53, %v952_v53 }
 0x357   :  { %991 = vmatmul.mubr.bf16.vlgmr.msra.gmra.mxu0 %v957_v57  ;;  %1032 = vmatmul.mubr.bf16.vlgmr.msra.gmra.mxu1 %v957_v57 }
 0x358   :  { %1074 = vmatpush1.bf16.msra.mxu0 %v2215_v20  ;;  %1115 = vmatpush1.bf16.msra.mxu1 %v2217_v21 }
 0x359   :  { %1075 = vmatprep.subr.bf16.mxu0 %v2219_v22  ;;  %1116 = vmatprep.subr.bf16.mxu1 %v2223_v23 }
 0x35a   :  { %1105 = vmatprep.mubr.bf16.mxu0 %v2790_v4  ;;  %1146 = vmatprep.mubr.bf16.mxu1 %v2790_v4 }
 0x35c   :  { %1076 = vmatpush1.bf16.msra.mxu0 %v2227_v24  ;;  %1117 = vmatpush1.bf16.msra.mxu1 %v2231_v25 }
 0x35d   :  { %1077 = vmatprep.subr.bf16.mxu0 %v2233_v26  ;;  %1118 = vmatprep.subr.bf16.mxu1 %v2237_v27 }
 0x360   :  { %1078 = vmatpush1.bf16.msra.mxu0 %v2241_v29  ;;  %1119 = vmatpush1.bf16.msra.mxu1 %v2243_v30 }
 0x361   :  { %1079 = vmatprep.subr.bf16.mxu0 %v2247_v31  ;;  %1120 = vmatprep.subr.bf16.mxu1 %v2251_v32 }
 0x364   :  { %1080 = vmatpush1.bf16.msra.mxu0 %v2255_v33  ;;  %1121 = vmatpush1.bf16.msra.mxu1 %v2259_v34 }
 0x365   :  { %1081 = vmatprep.subr.bf16.mxu0 %v2263_v35  ;;  %1122 = vmatprep.subr.bf16.mxu1 %v2265_v36 }
 0x368   :  { %1082 = vmatpush1.bf16.msra.mxu0 %v2269_v38  ;;  %1123 = vmatpush1.bf16.msra.mxu1 %v2273_v39 }
 0x369   :  { %1083 = vmatprep.subr.bf16.mxu0 %v2275_v40  ;;  %1124 = vmatprep.subr.bf16.mxu1 %v2279_v41 }
 0x36c   :  { %1084 = vmatpush1.bf16.msra.mxu0 %v2283_v42  ;;  %1125 = vmatpush1.bf16.msra.mxu1 %v2285_v43 }
 0x36d   :  { %1085 = vmatprep.subr.bf16.mxu0 %v2287_v44  ;;  %1126 = vmatprep.subr.bf16.mxu1 %v2291_v45 }
 0x370   :  { %1086 = vmatpush1.bf16.msra.mxu0 %v2297_v47  ;;  %1127 = vmatpush1.bf16.msra.mxu1 %v2299_v48 }
 0x371   :  { %1087 = vmatprep.subr.bf16.mxu0 %v2301_v49  ;;  %1128 = vmatprep.subr.bf16.mxu1 %v2307_v50 }
 0x374   :  { %1088 = vmatpush1.bf16.msra.mxu0 %v2313_v51  ;;  %1129 = vmatpush1.bf16.msra.mxu1 %v2315_v52 }
 0x375   :  { %1188 = vmatprep.subr.bf16.mxu0 %v2211_v17  ;;  %1229 = vmatprep.subr.bf16.mxu1 %v2213_v18  ;;  %v2795_v18 = vld [vmem:[#allocation20_spill] sm:$0xff] }
 0x417   :  { %v992_v8 = vpop.f32.mrf.mxu0  ;;  %v1033_v56 = vpop.f32.mrf.mxu1 }
 0x418   :  { %v1040_v62 = vadd.f32 %v992_v8, %v2792_v46  ;;  %v1042_v17 = vadd.f32 %v1033_v56, %v2794_v58 }
 0x419   :  { %v994_v55 = vpop.f32.mrf.mxu0  ;;  %v1035_v10 = vpop.f32.mrf.mxu1 }
 0x41a   :  { %v1727_v5 = vmul.f32 -1.442695, %v1040_v62  ;;  %v1041_v0 = vadd.f32 %v994_v55, %v2793_v60  ;;  %v1729_v15 = vmul.f32 -1.442695, %v1042_v17  ;;  %v1043_v59 = vadd.f32 %v1035_v10, %v2795_v18  ;;  %v2627_v18 = vld [vmem:[#allocation8 + $0xe0] ss:$16 sps:$4 sm:$0xff]  }
 0x41b   :  { %v996_v7 = vpop.f32.mrf.mxu0  ;;  %v1037_v1 = vpop.f32.mrf.mxu1 }
 0x41c   :  { %1924 = vpow2.f32 %v1727_v5  ;;  %v1728_v11 = vmul.f32 -1.442695, %v1041_v0 }
 0x41d   :  { %v997_v3 = vpop.f32.mrf.mxu0  ;;  %v1038_v54 = vpop.f32.mrf.mxu1 }
 0x41e   :  { %1926 = vpow2.f32 %v1728_v11 }
 0x41f   :  { %1928 = vpow2.f32 %v1729_v15 }
 0x420   :  { %1930 = vtanh.f32 %v1043_v59  ;;  %v2630_v59 = vld [vmem:[#allocation8 + $0xe8] ss:$16 sps:$4 sm:$0xff]  }
 0x429   :  { %v1925_v37 = vpop.eup %1924 }
 0x42a   :  { %v1053_v9 = vadd.f32 1.0, %v1925_v37  ;;  %v2633_v37 = vld [vmem:[#allocation8 + $0xc4] ss:$16 sps:$4 sm:$0xff]  }
 0x42b   :  { %v1927_v13 = vpop.eup %1926 }
 0x42c   :  { %1932 = vrcp.f32 %v1053_v9  ;;  %v1054_v12 = vadd.f32 1.0, %v1927_v13  ;;  %v1929_v2 = vpop.eup %1928  ;;  %v2636_v9 = vld [vmem:[#allocation8 + $0xcc] ss:$16 sps:$4 sm:$0xff]   ;;  %v2641_v13 = vld [vmem:[#allocation8 + $0xc0] ss:$16 sps:$4 sm:$0xff]  }
 0x42d   :  { %v1931_v63 = vpop.eup %1930  ;;  %v1055_v53 = vadd.f32 1.0, %v1929_v2  ;;  %v2647_v2 = vld [vmem:[#allocation8 + $0xa4] ss:$16 sps:$4 sm:$0xff]  }
 0x42e   :  { %1934 = vrcp.f32 %v1054_v12  ;;  %v2644_v12 = vld [vmem:[#allocation8 + $0xc8] ss:$16 sps:$4 sm:$0xff]  }
 0x42f   :  { %1936 = vrcp.f32 %v1055_v53  ;;  %v2662_v53 = vld [vmem:[#allocation8 + $0x8c] ss:$16 sps:$4 sm:$0xff]  }
 0x439   :  { %v1933_v6 = vpop.eup %1932 }
 0x43a   :  { %v1064_v61 = vmul.f32 %v1933_v6, %v1931_v63  ;;  %v2650_v63 = vld [vmem:[#allocation8 + $0xac] ss:$16 sps:$4 sm:$0xff]   ;;  %v2653_v6 = vld [vmem:[#allocation8 + $0xa0] ss:$16 sps:$4 sm:$0xff]  }
 0x43b   :  { %v1935_v28 = vpop.eup %1934 }
 0x43c   :  { %v1063_v57 = vmul.f32 %v1935_v28, %v2536_v16  ;;  %v1937_v56 = vpop.eup %1936  ;;  %v2659_v28 = vld [vmem:[#allocation8 + $0x84] ss:$16 sps:$4 sm:$0xff]  }
 0x43e   :  { %v2578_v8 = vadd.f32 %v1064_v61, %v1063_v57  ;;  %v2656_v61 = vld [vmem:[#allocation8 + $0xa8] ss:$16 sps:$4 sm:$0xff]   ;;  %v2665_v57 = vld [vmem:[#allocation8 + $0x80] ss:$16 sps:$4 sm:$0xff]  }
 0x440   :  { %1938 = vtanh.f32 %v2578_v8 }
 0x44d   :  { %v1939_v46 = vpop.eup %1938 }
 0x44e   :  { %v1067_v62 = vmul.f32 %v1939_v46, %v1937_v56  ;;  %v2671_v56 = vld [vmem:[#allocation8 + $0x64] ss:$16 sps:$4 sm:$0xff]   ;;  %v2674_v46 = vld [vmem:[#allocation8 + $0x6c] ss:$16 sps:$4 sm:$0xff]  }
 0x450   :  { %v1072_v55 = vpack.c.bf16 %v1067_v62, %v1067_v62  ;;  %v2677_v62 = vld [vmem:[#allocation8 + $0x60] ss:$16 sps:$4 sm:$0xff]  }
 0x452   :  { %1106 = vmatmul.mubr.bf16.vlgmr.msra.gmra.mxu0 %v1072_v55  ;;  %1147 = vmatmul.mubr.bf16.vlgmr.msra.gmra.mxu1 %v1072_v55  ;;  %v2680_v55 = vld [vmem:[#allocation8 + $0x68] ss:$16 sps:$4 sm:$0xff]  }
 0x453   :  { %1189 = vmatpush1.bf16.msra.mxu0 %v2215_v20  ;;  %1230 = vmatpush1.bf16.msra.mxu1 %v2217_v21  ;;  %v2613_v20 = vld [vmem:[#allocation8 + $0xe4] ss:$16 sps:$4 sm:$0xff]   ;;  %v2616_v21 = vld [vmem:[#allocation8 + $0xec] ss:$16 sps:$4 sm:$0xff]  }
 0x454   :  { %1190 = vmatprep.subr.bf16.mxu0 %v2219_v22  ;;  %1231 = vmatprep.subr.bf16.mxu1 %v2223_v23 }
 0x455   :  { %1220 = vmatprep.mubr.bf16.mxu0 %v2790_v4  ;;  %1261 = vmatprep.mubr.bf16.mxu1 %v2790_v4 }
 0x457   :  { %1191 = vmatpush1.bf16.msra.mxu0 %v2227_v24  ;;  %1232 = vmatpush1.bf16.msra.mxu1 %v2231_v25  ;;  %v2796_v24 = vld [vmem:[#allocation21_spill] sm:$0xff] }
 0x458   :  { %1192 = vmatprep.subr.bf16.mxu0 %v2233_v26  ;;  %1233 = vmatprep.subr.bf16.mxu1 %v2237_v27 }
 0x45b   :  { %1193 = vmatpush1.bf16.msra.mxu0 %v2241_v29  ;;  %1234 = vmatpush1.bf16.msra.mxu1 %v2243_v30  ;;  %v2797_v30 = vld [vmem:[#allocation23_spill] sm:$0xff] }
 0x45c   :  { %1194 = vmatprep.subr.bf16.mxu0 %v2247_v31  ;;  %1235 = vmatprep.subr.bf16.mxu1 %v2251_v32 }
 0x45f   :  { %1195 = vmatpush1.bf16.msra.mxu0 %v2255_v33  ;;  %1236 = vmatpush1.bf16.msra.mxu1 %v2259_v34 }
 0x460   :  { %1196 = vmatprep.subr.bf16.mxu0 %v2263_v35  ;;  %1237 = vmatprep.subr.bf16.mxu1 %v2265_v36 }
 0x463   :  { %1197 = vmatpush1.bf16.msra.mxu0 %v2269_v38  ;;  %1238 = vmatpush1.bf16.msra.mxu1 %v2273_v39  ;;  %v2798_v38 = vld [vmem:[#allocation22_spill] sm:$0xff] }
 0x464   :  { %1198 = vmatprep.subr.bf16.mxu0 %v2275_v40  ;;  %1239 = vmatprep.subr.bf16.mxu1 %v2279_v41  ;;  %v2799_v41 = vld [vmem:[#allocation24_spill] sm:$0xff] }
 0x467   :  { %1199 = vmatpush1.bf16.msra.mxu0 %v2283_v42  ;;  %1240 = vmatpush1.bf16.msra.mxu1 %v2285_v43 }
 0x468   :  { %1200 = vmatprep.subr.bf16.mxu0 %v2287_v44  ;;  %1241 = vmatprep.subr.bf16.mxu1 %v2291_v45 }
 0x46b   :  { %1201 = vmatpush1.bf16.msra.mxu0 %v2297_v47  ;;  %1242 = vmatpush1.bf16.msra.mxu1 %v2299_v48 }
 0x46c   :  { %1202 = vmatprep.subr.bf16.mxu0 %v2301_v49  ;;  %1243 = vmatprep.subr.bf16.mxu1 %v2307_v50 }
 0x46f   :  { %1203 = vmatpush1.bf16.msra.mxu0 %v2313_v51  ;;  %1244 = vmatpush1.bf16.msra.mxu1 %v2315_v52 }
 0x470   :  { %1303 = vmatprep.subr.bf16.mxu0 %v2613_v20  ;;  %1344 = vmatprep.subr.bf16.mxu1 %v2616_v21 }
 0x512   :  { %v1107_v22 = vpop.f32.mrf.mxu0  ;;  %v1148_v23 = vpop.f32.mrf.mxu1 }
 0x513   :  { %v1155_v25 = vadd.f32 %v1107_v22, %v2796_v24  ;;  %v1157_v39 = vadd.f32 %v1148_v23, %v2798_v38  ;;  %v2683_v22 = vld [vmem:[#allocation8 + $0x44] ss:$16 sps:$4 sm:$0xff]   ;;  %v2686_v23 = vld [vmem:[#allocation8 + $0x4c] ss:$16 sps:$4 sm:$0xff]   ;;  %v2689_v24 = vld [vmem:[#allocation8 + $0x40] ss:$16 sps:$4 sm:$0xff]  }
 0x514   :  { %v1109_v26 = vpop.f32.mrf.mxu0  ;;  %v1150_v27 = vpop.f32.mrf.mxu1 }
 0x515   :  { %v1730_v29 = vmul.f32 -1.442695, %v1155_v25  ;;  %v1156_v31 = vadd.f32 %v1109_v26, %v2797_v30  ;;  %v1732_v40 = vmul.f32 -1.442695, %v1157_v39  ;;  %v1158_v42 = vadd.f32 %v1150_v27, %v2799_v41  ;;  %v2692_v25 = vld [vmem:[#allocation8 + $0x48] ss:$16 sps:$4 sm:$0xff]  }
 0x516   :  { %v1111_v32 = vpop.f32.mrf.mxu0  ;;  %v1152_v33 = vpop.f32.mrf.mxu1  ;;  %v2695_v26 = vld [vmem:[#allocation8 + $0x24] ss:$16 sps:$4 sm:$0xff]   ;;  %v2698_v27 = vld [vmem:[#allocation8 + $0x2c] ss:$16 sps:$4 sm:$0xff]  }
 0x517   :  { %1940 = vpow2.f32 %v1730_v29  ;;  %v1731_v34 = vmul.f32 -1.442695, %v1156_v31  ;;  %v2800_v31 = vld [vmem:[#allocation25_spill] sm:$0xff] }
 0x518   :  { %v1112_v35 = vpop.f32.mrf.mxu0  ;;  %v1153_v36 = vpop.f32.mrf.mxu1 }
 0x519   :  { %1942 = vpow2.f32 %v1731_v34 }
 0x51a   :  { %1944 = vpow2.f32 %v1732_v40 }
 0x51b   :  { %1946 = vtanh.f32 %v1158_v42 }
 0x524   :  { %v1941_v43 = vpop.eup %1940 }
 0x525   :  { %v1168_v44 = vadd.f32 1.0, %v1941_v43 }
 0x526   :  { %v1943_v45 = vpop.eup %1942 }
 0x527   :  { %1948 = vrcp.f32 %v1168_v44  ;;  %v1169_v16 = vadd.f32 1.0, %v1943_v45  ;;  %v1945_v10 = vpop.eup %1944 }
 0x528   :  { %v1947_v5 = vpop.eup %1946  ;;  %v1170_v1 = vadd.f32 1.0, %v1945_v10 }
 0x529   :  { %1950 = vrcp.f32 %v1169_v16 }
 0x52a   :  { %1952 = vrcp.f32 %v1170_v1 }
 0x534   :  { %v1949_v60 = vpop.eup %1948 }
 0x535   :  { %v1179_v0 = vmul.f32 %v1949_v60, %v1947_v5 }
 0x536   :  { %v1951_v7 = vpop.eup %1950 }
 0x537   :  { %v1178_v11 = vmul.f32 %v1951_v7, %v2578_v8  ;;  %v1953_v54 = vpop.eup %1952  ;;  %v2668_v8 = vld [vmem:[#allocation8 + $0x88] ss:$16 sps:$4 sm:$0xff]  }
 0x539   :  { %v2624_v3 = vadd.f32 %v1179_v0, %v1178_v11 }
 0x53b   :  { %1954 = vtanh.f32 %v2624_v3 }
 0x548   :  { %v1955_v58 = vpop.eup %1954 }
 0x549   :  { %v1182_v17 = vmul.f32 %v1955_v58, %v1953_v54 }
 0x54b   :  { %v1187_v15 = vpack.c.bf16 %v1182_v17, %v1182_v17 }
 0x54d   :  { %1221 = vmatmul.mubr.bf16.vlgmr.msra.gmra.mxu0 %v1187_v15  ;;  %1262 = vmatmul.mubr.bf16.vlgmr.msra.gmra.mxu1 %v1187_v15  ;;  %v2032_v15 = vld [vmem:[#allocation8 + $0x4] ss:$16 sps:$4 sm:$0xff]  }
 0x54e   :  { %1304 = vmatpush1.bf16.msra.mxu0 %v2627_v18  ;;  %1345 = vmatpush1.bf16.msra.mxu1 %v2630_v59 }
 0x54f   :  { %1305 = vmatprep.subr.bf16.mxu0 %v2633_v37  ;;  %1346 = vmatprep.subr.bf16.mxu1 %v2636_v9 }
 0x550   :  { %1335 = vmatprep.mubr.bf16.mxu0 %v2790_v4  ;;  %1376 = vmatprep.mubr.bf16.mxu1 %v2790_v4 }
 0x552   :  { %1306 = vmatpush1.bf16.msra.mxu0 %v2641_v13  ;;  %1347 = vmatpush1.bf16.msra.mxu1 %v2644_v12 }
 0x553   :  { %1307 = vmatprep.subr.bf16.mxu0 %v2647_v2  ;;  %1348 = vmatprep.subr.bf16.mxu1 %v2650_v63 }
 0x556   :  { %1308 = vmatpush1.bf16.msra.mxu0 %v2653_v6  ;;  %1349 = vmatpush1.bf16.msra.mxu1 %v2656_v61 }
 0x557   :  { %1309 = vmatprep.subr.bf16.mxu0 %v2659_v28  ;;  %1350 = vmatprep.subr.bf16.mxu1 %v2662_v53 }
 0x55a   :  { %1310 = vmatpush1.bf16.msra.mxu0 %v2665_v57  ;;  %1351 = vmatpush1.bf16.msra.mxu1 %v2668_v8 }
 0x55b   :  { %1311 = vmatprep.subr.bf16.mxu0 %v2671_v56  ;;  %1352 = vmatprep.subr.bf16.mxu1 %v2674_v46 }
 0x55e   :  { %1312 = vmatpush1.bf16.msra.mxu0 %v2677_v62  ;;  %1353 = vmatpush1.bf16.msra.mxu1 %v2680_v55 }
 0x55f   :  { %1313 = vmatprep.subr.bf16.mxu0 %v2683_v22  ;;  %1354 = vmatprep.subr.bf16.mxu1 %v2686_v23 }
 0x562   :  { %1314 = vmatpush1.bf16.msra.mxu0 %v2689_v24  ;;  %1355 = vmatpush1.bf16.msra.mxu1 %v2692_v25 }
 0x563   :  { %1315 = vmatprep.subr.bf16.mxu0 %v2695_v26  ;;  %1356 = vmatprep.subr.bf16.mxu1 %v2698_v27 }
 0x566   :  { %1316 = vmatpush1.bf16.msra.mxu0 %v2297_v47  ;;  %1357 = vmatpush1.bf16.msra.mxu1 %v2299_v48  ;;  %v2801_v48 = vld [vmem:[#allocation27_spill] sm:$0xff] }
 0x567   :  { %1317 = vmatprep.subr.bf16.mxu0 %v2301_v49  ;;  %1358 = vmatprep.subr.bf16.mxu1 %v2307_v50 }
 0x56a   :  { %1318 = vmatpush1.bf16.msra.mxu0 %v2313_v51  ;;  %1359 = vmatpush1.bf16.msra.mxu1 %v2315_v52  ;;  %v2802_v52 = vld [vmem:[#allocation26_spill] sm:$0xff] }
 0x56b   :  { %1418 = vmatprep.subr.bf16.mxu0 %v2613_v20  ;;  %1459 = vmatprep.subr.bf16.mxu1 %v2616_v21  ;;  %v2803_v21 = vld [vmem:[#allocation28_spill] sm:$0xff] }
 0x60d   :  { %v1222_v29 = vpop.f32.mrf.mxu0  ;;  %v1263_v30 = vpop.f32.mrf.mxu1 }
 0x60e   :  { %v1270_v32 = vadd.f32 %v1222_v29, %v2800_v31  ;;  %v1272_v20 = vadd.f32 %v1263_v30, %v2802_v52  ;;  %v1868_v52 = vld [vmem:[#allocation9 + $0x38] sm:$0xff]  }
 0x60f   :  { %v1224_v33 = vpop.f32.mrf.mxu0  ;;  %v1265_v47 = vpop.f32.mrf.mxu1 }
 0x610   :  { %v1733_v34 = vmul.f32 -1.442695, %v1270_v32  ;;  %v1271_v35 = vadd.f32 %v1224_v33, %v2801_v48  ;;  %v1735_v39 = vmul.f32 -1.442695, %v1272_v20  ;;  %v1273_v40 = vadd.f32 %v1265_v47, %v2803_v21  ;;  %v1870_v21 = vld [vmem:[#allocation9 + $0x28] sm:$0xff]  }
 0x611   :  { %v1226_v49 = vpop.f32.mrf.mxu0  ;;  %v1267_v36 = vpop.f32.mrf.mxu1  ;;  %v2153_v20 = vmov 0.0  }
 0x612   :  { %1956 = vpow2.f32 %v1733_v34  ;;  %v1734_v50 = vmul.f32 -1.442695, %v1271_v35 }
 0x613   :  { %v1227_v51 = vpop.f32.mrf.mxu0  ;;  %v1268_v38 = vpop.f32.mrf.mxu1 }
 0x614   :  { %1958 = vpow2.f32 %v1734_v50 }
 0x615   :  { %1960 = vpow2.f32 %v1735_v39  ;;  %v1869_v39 = vld [vmem:[#allocation9 + $0x30] sm:$0xff]  }
 0x616   :  { %1962 = vtanh.f32 %v1273_v40  ;;  %v1871_v40 = vld [vmem:[#allocation9 + $0x20] sm:$0xff]  }
 0x61f   :  { %v1957_v41 = vpop.eup %1956 }
 0x620   :  { %v1283_v42 = vadd.f32 1.0, %v1957_v41  ;;  %v1872_v41 = vld [vmem:[#allocation9 + $0x18] sm:$0xff]  }
 0x621   :  { %v1959_v43 = vpop.eup %1958 }
 0x622   :  { %1964 = vrcp.f32 %v1283_v42  ;;  %v1284_v44 = vadd.f32 1.0, %v1959_v43  ;;  %v1961_v45 = vpop.eup %1960  ;;  %v1873_v42 = vld [vmem:[#allocation9 + $0x10] sm:$0xff]   ;;  %v1874_v43 = vld [vmem:[#allocation9 + $0x8] sm:$0xff]  }
 0x623   :  { %v1963_v16 = vpop.eup %1962  ;;  %v1285_v0 = vadd.f32 1.0, %v1961_v45 }
 0x624   :  { %1966 = vrcp.f32 %v1284_v44  ;;  %v1875_v44 = vld [vmem:[#allocation9] sm:$0xff]  }
 0x625   :  { %1968 = vrcp.f32 %v1285_v0 }
 0x62f   :  { %v1965_v10 = vpop.eup %1964 }
 0x630   :  { %v1294_v5 = vmul.f32 %v1965_v10, %v1963_v16  ;;  %v2808_v10 = vld [vmem:[#allocation33_spill] sm:$0xff] }
 0x631   :  { %v1967_v60 = vpop.eup %1966 }
 0x632   :  { %v1293_v7 = vmul.f32 %v1967_v60, %v2624_v3  ;;  %v1969_v11 = vpop.eup %1968  ;;  %v2031_v3 = vld [vmem:[#allocation8 + $0x28] ss:$16 sps:$4 sm:$0xff]  }
 0x634   :  { %v2714_v1 = vadd.f32 %v1294_v5, %v1293_v7 }
 0x636   :  { %1970 = vtanh.f32 %v2714_v1 }
 0x643   :  { %v1971_v54 = vpop.eup %1970 }
 0x644   :  { %v1297_v58 = vmul.f32 %v1971_v54, %v1969_v11 }
 0x646   :  { %v1302_v17 = vpack.c.bf16 %v1297_v58, %v1297_v58 }
 0x648   :  { %1336 = vmatmul.mubr.bf16.vlgmr.msra.gmra.mxu0 %v1302_v17  ;;  %1377 = vmatmul.mubr.bf16.vlgmr.msra.gmra.mxu1 %v1302_v17 }
 0x649   :  { %1419 = vmatpush1.bf16.msra.mxu0 %v2627_v18  ;;  %1460 = vmatpush1.bf16.msra.mxu1 %v2630_v59  ;;  %v2033_v18 = vld [vmem:[#allocation8 + $0xc] ss:$16 sps:$4 sm:$0xff]   ;;  %v2034_v59 = vld [vmem:[#allocation8] ss:$16 sps:$4 sm:$0xff]  }
 0x64a   :  { %1420 = vmatprep.subr.bf16.mxu0 %v2633_v37  ;;  %1461 = vmatprep.subr.bf16.mxu1 %v2636_v9  ;;  %v2035_v37 = vld [vmem:[#allocation8 + $0x8] ss:$16 sps:$4 sm:$0xff]  }
 0x64b   :  { %1450 = vmatprep.mubr.bf16.mxu0 %v2790_v4  ;;  %1491 = vmatprep.mubr.bf16.mxu1 %v2790_v4  ;;  %v2030_v4 = vld [vmem:[#allocation8 + $0x20] ss:$16 sps:$4 sm:$0xff]  }
 0x64d   :  { %1421 = vmatpush1.bf16.msra.mxu0 %v2641_v13  ;;  %1462 = vmatpush1.bf16.msra.mxu1 %v2644_v12  ;;  %v2804_v12 = vld [vmem:[#allocation29_spill] sm:$0xff] }
 0x64e   :  { %1422 = vmatprep.subr.bf16.mxu0 %v2647_v2  ;;  %1463 = vmatprep.subr.bf16.mxu1 %v2650_v63 }
 0x651   :  { %1423 = vmatpush1.bf16.msra.mxu0 %v2653_v6  ;;  %1464 = vmatpush1.bf16.msra.mxu1 %v2656_v61 }
 0x652   :  { %1424 = vmatprep.subr.bf16.mxu0 %v2659_v28  ;;  %1465 = vmatprep.subr.bf16.mxu1 %v2662_v53  ;;  %v2805_v28 = vld [vmem:[#allocation31_spill] sm:$0xff] }
 0x655   :  { %1425 = vmatpush1.bf16.msra.mxu0 %v2665_v57  ;;  %1466 = vmatpush1.bf16.msra.mxu1 %v2668_v8 }
 0x656   :  { %1426 = vmatprep.subr.bf16.mxu0 %v2671_v56  ;;  %1467 = vmatprep.subr.bf16.mxu1 %v2674_v46 }
 0x659   :  { %1427 = vmatpush1.bf16.msra.mxu0 %v2677_v62  ;;  %1468 = vmatpush1.bf16.msra.mxu1 %v2680_v55  ;;  %v2806_v55 = vld [vmem:[#allocation30_spill] sm:$0xff] }
 0x65a   :  { %1428 = vmatprep.subr.bf16.mxu0 %v2683_v22  ;;  %1469 = vmatprep.subr.bf16.mxu1 %v2686_v23 }
 0x65d   :  { %1429 = vmatpush1.bf16.msra.mxu0 %v2689_v24  ;;  %1470 = vmatpush1.bf16.msra.mxu1 %v2692_v25  ;;  %v2807_v24 = vld [vmem:[#allocation32_spill] sm:$0xff] }
 0x65e   :  { %1430 = vmatprep.subr.bf16.mxu0 %v2695_v26  ;;  %1471 = vmatprep.subr.bf16.mxu1 %v2698_v27 }
 0x661   :  { %1431 = vmatpush1.bf16.msra.mxu0 %v2030_v4  ;;  %1472 = vmatpush1.bf16.msra.mxu1 %v2031_v3  ;;  %v2809_v3 = vld [vmem:[#allocation34_spill] sm:$0xff] }
 0x662   :  { %1432 = vmatprep.subr.bf16.mxu0 %v2032_v15  ;;  %1473 = vmatprep.subr.bf16.mxu1 %v2033_v18 }
 0x665   :  { %1433 = vmatpush1.bf16.msra.mxu0 %v2034_v59  ;;  %1474 = vmatpush1.bf16.msra.mxu1 %v2035_v37 }
 0x666   :  { %1760 = vmatprep.subr.bf16.mxu0 %v2153_v20 }
 0x708   :  { %v1337_v9 = vpop.f32.mrf.mxu0  ;;  %v1378_v13 = vpop.f32.mrf.mxu1 }
 0x709   :  { %v1385_v2 = vadd.f32 %v1337_v9, %v2804_v12  ;;  %v1387_v22 = vadd.f32 %v1378_v13, %v2806_v55 }
 0x70a   :  { %v1339_v63 = vpop.f32.mrf.mxu0  ;;  %v1380_v6 = vpop.f32.mrf.mxu1 }
 0x70b   :  { %v1736_v61 = vmul.f32 -1.442695, %v1385_v2  ;;  %v1386_v53 = vadd.f32 %v1339_v63, %v2805_v28  ;;  %v1738_v23 = vmul.f32 -1.442695, %v1387_v22  ;;  %v1388_v25 = vadd.f32 %v1380_v6, %v2807_v24 }
 0x70c   :  { %v1341_v57 = vpop.f32.mrf.mxu0  ;;  %v1382_v8 = vpop.f32.mrf.mxu1 }
 0x70d   :  { %1972 = vpow2.f32 %v1736_v61  ;;  %v1737_v56 = vmul.f32 -1.442695, %v1386_v53 }
 0x70e   :  { %v1342_v46 = vpop.f32.mrf.mxu0  ;;  %v1383_v62 = vpop.f32.mrf.mxu1 }
 0x70f   :  { %1974 = vpow2.f32 %v1737_v56  ;;  %v1742_v62 = vld [vmem:[%s2767_s5] ss:$0 sm:$0xff] }
 0x710   :  { %1976 = vpow2.f32 %v1738_v23 }
 0x711   :  { %1978 = vtanh.f32 %v1388_v25 }
 0x71a   :  { %v1973_v26 = vpop.eup %1972 }
 0x71b   :  { %v1398_v27 = vadd.f32 1.0, %v1973_v26 }
 0x71c   :  { %v1975_v29 = vpop.eup %1974 }
 0x71d   :  { %1980 = vrcp.f32 %v1398_v27  ;;  %v1399_v30 = vadd.f32 1.0, %v1975_v29  ;;  %v1977_v31 = vpop.eup %1976 }
 0x71e   :  { %v1979_v32 = vpop.eup %1978  ;;  %v1400_v48 = vadd.f32 1.0, %v1977_v31 }
 0x71f   :  { %1982 = vrcp.f32 %v1399_v30 }
 0x720   :  { %1984 = vrcp.f32 %v1400_v48 }
 0x72a   :  { %v1981_v33 = vpop.eup %1980 }
 0x72b   :  { %v1409_v47 = vmul.f32 %v1981_v33, %v1979_v32 }
 0x72c   :  { %v1983_v34 = vpop.eup %1982 }
 0x72d   :  { %v1408_v35 = vmul.f32 %v1983_v34, %v2714_v1  ;;  %v1985_v36 = vpop.eup %1984 }
 0x72f   :  { %v2748_v49 = vadd.f32 %v1409_v47, %v1408_v35 }
 0x731   :  { %1986 = vtanh.f32 %v2748_v49 }
 0x73e   :  { %v1987_v50 = vpop.eup %1986 }
 0x73f   :  { %v1412_v51 = vmul.f32 %v1987_v50, %v1985_v36 }
 0x741   :  { %v1417_v38 = vpack.c.bf16 %v1412_v51, %v1412_v51 }
 0x743   :  { %1451 = vmatmul.mubr.bf16.vlgmr.msra.gmra.mxu0 %v1417_v38  ;;  %1492 = vmatmul.mubr.bf16.vlgmr.msra.gmra.mxu1 %v1417_v38 }
 0x744   :  { %1761 = vmatpush3.bf16.msra.mxu0 %v1868_v52  ;;  %1776 = vmatprep.mubr.msk.bf16.mxu0 %vm2154_vm1, %v2153_v20 }
 0x745   :  { %1762 = vmatprep.subr.bf16.mxu0 %v2153_v20 }
 0x748   :  { %1763 = vmatpush3.bf16.msra.mxu0 %v1869_v39 }
 0x749   :  { %1764 = vmatprep.subr.bf16.mxu0 %v2153_v20 }
 0x74c   :  { %1765 = vmatpush3.bf16.msra.mxu0 %v1870_v21 }
 0x74d   :  { %1766 = vmatprep.subr.bf16.mxu0 %v2153_v20 }
 0x750   :  { %1767 = vmatpush3.bf16.msra.mxu0 %v1871_v40 }
 0x751   :  { %1768 = vmatprep.subr.bf16.mxu0 %v2153_v20 }
 0x754   :  { %1769 = vmatpush3.bf16.msra.mxu0 %v1872_v41 }
 0x755   :  { %1770 = vmatprep.subr.bf16.mxu0 %v2153_v20 }
 0x758   :  { %1771 = vmatpush3.bf16.msra.mxu0 %v1873_v42 }
 0x759   :  { %1772 = vmatprep.subr.bf16.mxu0 %v2153_v20 }
 0x75c   :  { %1773 = vmatpush3.bf16.msra.mxu0 %v1874_v43 }
 0x75d   :  { %1774 = vmatprep.subr.bf16.mxu0 %v2153_v20 }
 0x760   :  { %1775 = vmatpush3.bf16.msra.mxu0 %v1875_v44 }
 0x803   :  { %v1452_v45 = vpop.f32.mrf.mxu0  ;;  %v1493_v16 = vpop.f32.mrf.mxu1 }
 0x804   :  { %v1500_v5 = vadd.f32 %v1452_v45, %v2808_v10  ;;  %v1502_v15 = vadd.f32 %v1493_v16, %v2809_v3 }
 0x805   :  { %v1454_v60 = vpop.f32.mrf.mxu0  ;;  %v1495_v0 = vpop.f32.mrf.mxu1 }
 0x806   :  { %v1739_v7 = vmul.f32 -1.442695, %v1500_v5  ;;  %v1501_v1 = vadd.f32 %v1454_v60, %v2442_v14  ;;  %v1741_v18 = vmul.f32 -1.442695, %v1502_v15  ;;  %v1503_v59 = vadd.f32 %v1495_v0, %v2445_v19 }
 0x807   :  { %v1456_v11 = vpop.f32.mrf.mxu0  ;;  %v1497_v54 = vpop.f32.mrf.mxu1 }
 0x808   :  { %1988 = vpow2.f32 %v1739_v7  ;;  %v1740_v58 = vmul.f32 -1.442695, %v1501_v1 }
 0x809   :  { %v1457_v17 = vpop.f32.mrf.mxu0  ;;  %v1498_v4 = vpop.f32.mrf.mxu1 }
 0x80a   :  { %1990 = vpow2.f32 %v1740_v58 }
 0x80b   :  { %1992 = vpow2.f32 %v1741_v18 }
 0x80c   :  { %1994 = vtanh.f32 %v1503_v59 }
 0x815   :  { %v1989_v37 = vpop.eup %1988 }
 0x816   :  { %v1513_v9 = vadd.f32 1.0, %v1989_v37 }
 0x817   :  { %v1991_v13 = vpop.eup %1990 }
 0x818   :  { %1996 = vrcp.f32 %v1513_v9  ;;  %v1514_v12 = vadd.f32 1.0, %v1991_v13  ;;  %v1993_v14 = vpop.eup %1992 }
 0x819   :  { %v1995_v2 = vpop.eup %1994  ;;  %v1515_v28 = vadd.f32 1.0, %v1993_v14 }
 0x81a   :  { %1998 = vrcp.f32 %v1514_v12 }
 0x81b   :  { %2000 = vrcp.f32 %v1515_v28 }
 0x825   :  { %v1997_v63 = vpop.eup %1996 }
 0x826   :  { %v1524_v6 = vmul.f32 %v1997_v63, %v1995_v2 }
 0x827   :  { %v1999_v61 = vpop.eup %1998 }
 0x828   :  { %v1523_v53 = vmul.f32 %v1999_v61, %v2748_v49  ;;  %v2001_v19 = vpop.eup %2000 }
 0x82a   :  { %v1525_v57 = vadd.f32 %v1524_v6, %v1523_v53 }
 0x82c   :  { %2002 = vtanh.f32 %v1525_v57 }
 0x839   :  { %v2003_v8 = vpop.eup %2002 }
 0x83a   :  { %v1527_v56 = vmul.f32 %v2003_v8, %v2001_v19 }
 0x83c   :  { %v1528_v46 = vpack.c.bf16 %v1527_v56, %v1527_v56 }
 0x83e   :  { %1777 = vmatmul.mubr.bf16.vlgmr.msra.gmra.mxu0 %v1528_v46 }
 0x8fe   :  { %v1634_v55 = vpop.f32.mrf.mxu0 }
 0x8ff   :  { %v1635_v22 = vadd.f32 %v1742_v62, %v1634_v55 }
 0x900   :  { %v1778_v23 = vpop.f32.mrf.mxu0 }
 0x901   :  { %1640 = vst [vmem:[#allocation11] sm:$0xff] %v1635_v22 }
 0x902   :  { %v1637_v24 = vpop.f32.mrf.mxu0 }
 0x903   :  { %2127 = shalt.err (!%p2124_p10)
}
 0x904   :  { %1650 = dma.vmem_to_hbm [thread:$0]  %s1648_s21, 128, %s2768_s6, [#allocation5]   ;;  %v1779_v25 = vpop.f32.mrf.mxu0 }
 0x905   :  { %2142 = dma.done.wait [#allocation5], 128  }
 0x906   :  { %2143 = vsyncadd [#allocation5], 4294967168 }
 0x907   :  { %1654 = vsyncpa [#allocation4], 1 }
 0x908   :  { %1655 = vsyncpa [#allocation7], 1 }
 0x909   :  { %1656 = vsyncpa [#allocation10], 1 }
 0x90a   :  { %1657 = vsyncpa [#allocation5], 1 }

</bundles_post_ra>
